<compile_context>
chip_gen: v7x
topology: tpu7x:2x2x1
jax: 0.10.0
libtpu: 0.0.40
codegen_flags: <defaults>
</compile_context>

<pallas_src>
import math
from functools import partial

import jax
import jax.numpy as jnp
import numpy as np
from jax.experimental import pallas as pl
from jax.experimental.pallas import tpu as pltpu

# ----------------------- synthetic (small) configuration -----------------------
B = 2                 # batch
IN_CHANS = 1          # EAT: single-channel spectrogram "image"
IMG = 16              # spatial size (square)
PATCH = 4             # patch size
EMBED_DIM = 32        # cfg.embed_dim
NUM_HEADS = 4         # cfg.num_heads
MLP_RATIO = 4.0       # cfg.mlp_ratio
DEPTH = 2             # cfg.depth
NORM_EPS = 1e-6       # cfg.norm_eps
NUM_EXTRA_TOKENS = 1  # ImageEncoder CLS token
# cfg.layer_norm_first = True, cfg.prenet_depth = 0, dropout/layerdrop = 0 (eval)

N_PATCHES = (IMG // PATCH) ** 2            # 16
SEQ = N_PATCHES + NUM_EXTRA_TOKENS         # 17
PATCH_DIM = IN_CHANS * PATCH * PATCH       # 16
FFN_DIM = int(EMBED_DIM * MLP_RATIO)       # 128
HEAD_DIM = EMBED_DIM // NUM_HEADS          # 8


def _round_up(v, m):
    return (v + m - 1) // m * m


SEQ_PAD = _round_up(SEQ, 8)                # 24 : sublane-aligned token count
QKV_PAD = _round_up(3 * EMBED_DIM, 128)    # 128: lane-aligned QKV output width
HT = NUM_HEADS * SEQ_PAD                   # 96 : flattened (head, key) axis
assert FFN_DIM <= QKV_PAD and QKV_PAD == 128  # per-layer bias slab is (8, 128)


# ----------------------------- in-kernel helpers -------------------------------
def _layer_norm(x, g, b, eps):
    # PyTorch nn.LayerNorm semantics: biased variance over the last dim.
    mu = jnp.mean(x, axis=-1, keepdims=True)
    var = jnp.mean(jnp.square(x - mu), axis=-1, keepdims=True)
    return (x - mu) * jax.lax.rsqrt(var + eps) * g + b


def _mm(x, w):
    # MXU matmul: bf16 operands, f32 accumulation.
    return jnp.dot(x.astype(w.dtype), w, preferred_element_type=jnp.float32)


def _gelu(x):
    # TODO(synk): nn.GELU defaults to exact erf; erf has no guaranteed Mosaic
    # lowering, so the tanh approximation is used (<=1e-3 deviation).
    return jax.nn.gelu(x, approximate=True)


# ------------------------------ fused forward kernel ---------------------------
def fused_forward_kernel(
        patches_ref, patch_w_ref, embed_const_ref, key_bias_ref, bd_mask_ref,
        final_norm_ref, vec_ref,
        qkv_w_ref, proj_w_ref, fc1_w_ref, fc2_w_ref,
        x_out_ref, lr_out_ref,
        *, num_heads, eps, n_patches, depth):
    t_pad, d = embed_const_ref.shape
    bf16 = jnp.bfloat16

    # ---- patch embed: Conv2d(k=p, stride=p) as matmul; add [pos | CLS | 0] ----
    feats = _mm(patches_ref[...], patch_w_ref[...])            # (N, D) f32
    x = jnp.concatenate(
        [feats, jnp.zeros((t_pad - n_patches, d), jnp.float32)], axis=0)
    x = x + embed_const_ref[...]                               # (T_pad, D)

    key_bias = key_bias_ref[...]                               # (1, H*T_pad)
    bd_mask = bd_mask_ref[...]                                 # (H*T_pad, D)

    # ---- AltBlocks (layer_norm_first=True, eval: all dropouts identity) -------
    for li in range(depth):
        vec = vec_ref[li]                                      # (8, 128) slab
        ln1_g, ln1_b = vec[0:1, :d], vec[1:2, :d]
        ln2_g, ln2_b = vec[2:3, :d], vec[3:4, :d]
        proj_b, fc2_b = vec[4:5, :d], vec[5:6, :d]
        qkv_b = vec[6:7, :]                                    # (1, QKV_PAD)
        fc1_b = vec[7:8, :]                                    # (1, FFN_DIM)

        # ----- attention -----
        h = _layer_norm(x, ln1_g, ln1_b, eps)
        qkv = _mm(h, qkv_w_ref[li]) + qkv_b                    # (T_pad, 128)
        q = qkv[:, 0:d]                                        # scale pre-folded
        k = qkv[:, d:2 * d]
        v = qkv[:, 2 * d:3 * d]

        # Per-head structure without per-head slicing / transposes:
        # row h*T_pad+s of k_rows/v_rows keeps only head h's channels of
        # key/value s (block-diagonal mask precomputed on the host).
        k_rows = jnp.concatenate([k] * num_heads, axis=0) * bd_mask  # (HT, D)
        v_rows = jnp.concatenate([v] * num_heads, axis=0) * bd_mask  # (HT, D)

        att = jnp.einsum('td,rd->tr', q.astype(bf16), k_rows.astype(bf16),
                         preferred_element_type=jnp.float32)   # (T_pad, HT)
        att = att + key_bias                                   # mask padded keys
        # Global-row-max stabilizer: per-head softmax is shift invariant, so
        # this equals per-head-max softmax except in extreme dynamic-range
        # float edge cases (irrelevant at these magnitudes).
        att = jnp.exp(att - jnp.max(att, axis=-1, keepdims=True))
        # Per-head denominator, broadcast to that head's channels, via one f32
        # matmul against the same block-diagonal mask.
        denom = jnp.dot(att, bd_mask,
                        preferred_element_type=jnp.float32)    # (T_pad, D)
        o = jnp.einsum('tr,rc->tc', att.astype(bf16), v_rows.astype(bf16),
                       preferred_element_type=jnp.float32)     # (T_pad, D)
        o = o * pl.reciprocal(denom, approx=True)

        x = x + _mm(o, proj_w_ref[li]) + proj_b

        # ----- MLP -----
        h2 = _layer_norm(x, ln2_g, ln2_b, eps)
        ff = _mm(h2, fc1_w_ref[li]) + fc1_b
        ff = _gelu(ff)
        ff = _mm(ff, fc2_w_ref[li]) + fc2_b

        lr_out_ref[li] = ff                  # ffn target (ffn_targets=True)
        x = x + ff

    # ---- final LayerNorm + drop extra (CLS) / padding tokens ------------------
    fn = final_norm_ref[...]
    xn = _layer_norm(x, fn[0:1, :], fn[1:2, :], eps)
    x_out_ref[...] = xn[0:n_patches, :]      # sublane-aligned slice


# ------------------------------------ glue --------------------------------------
def patchify(x):
    # NCHW -> (B, N, C*p*p) rows, flattened in (C, ph, pw) order to match
    # Conv2d weight flattening.
    b_, c_, h_, w_ = x.shape
    hp, wp = h_ // PATCH, w_ // PATCH
    x = x.reshape(b_, c_, hp, PATCH, wp, PATCH)
    x = x.transpose(0, 2, 4, 1, 3, 5)
    return x.reshape(b_, hp * wp, c_ * PATCH * PATCH)


def get_2d_sincos_pos_embed(embed_dim, grid_size):
    def _1d(dim, pos):
        omega = np.arange(dim // 2, dtype=np.float64) / (dim / 2.0)
        omega = 1.0 / 10000 ** omega
        out = np.einsum('m,d->md', pos.reshape(-1), omega)
        return np.concatenate([np.sin(out), np.cos(out)], axis=1)

    grid_h = np.arange(grid_size, dtype=np.float64)
    grid_w = np.arange(grid_size, dtype=np.float64)
    grid = np.stack(np.meshgrid(grid_w, grid_h), axis=0)
    emb_h = _1d(embed_dim // 2, grid[0])
    emb_w = _1d(embed_dim // 2, grid[1])
    return np.concatenate([emb_h, emb_w], axis=1).astype(np.float32)


def init_params(key):
    # init_bert_params: Linear weight ~ N(0, 0.02), biases = 0, LayerNorm = (1, 0).
    bf16 = jnp.bfloat16

    def nrm(k, shape, scale=0.02):
        return jax.random.normal(k, shape, dtype=jnp.float32) * scale

    keys = jax.random.split(key, 2 + DEPTH)
    attn_scale = 1.0 / math.sqrt(HEAD_DIM)

    patch_w = nrm(keys[0], (PATCH_DIM, EMBED_DIM)).astype(bf16)
    patch_b = jnp.zeros((1, EMBED_DIM), jnp.float32)
    pos = jnp.asarray(get_2d_sincos_pos_embed(EMBED_DIM, IMG // PATCH))
    cls = nrm(keys[1], (NUM_EXTRA_TOKENS, EMBED_DIM))
    # Kernel sequence order: [patches | CLS | zero pad].  Pos embed is added to
    # patch tokens only (as in the EAT ImageEncoder); patch_b folded in here.
    embed_const = jnp.concatenate(
        [pos + patch_b, cls,
         jnp.zeros((SEQ_PAD - SEQ, EMBED_DIM), jnp.float32)], axis=0)

    # attention constants (host-precomputed, loop/grid-invariant)
    r = np.arange(HT)
    c = np.arange(EMBED_DIM)
    bd_mask = (r[:, None] // SEQ_PAD == c[None, :] // HEAD_DIM).astype(np.float32)
    key_bias = np.where((r % SEQ_PAD) < SEQ, 0.0, -1e30).astype(np.float32)[None, :]

    # per-layer bias/gamma slab (DEPTH, 8, 128):
    #   row 0/1: ln1 gamma/beta   row 2/3: ln2 gamma/beta   (first D lanes)
    #   row 4: proj bias          row 5: fc2 bias           (first D lanes)
    #   row 6: qkv bias (q part pre-scaled by 1/sqrt(dh))   (QKV_PAD lanes)
    #   row 7: fc1 bias                                      (FFN_DIM lanes)
    vec = np.zeros((DEPTH, 8, QKV_PAD), np.float32)
    vec[:, 0, :EMBED_DIM] = 1.0      # ln1_g
    vec[:, 2, :EMBED_DIM] = 1.0      # ln2_g
    # all biases zero under init_bert_params

    qkv_ws, proj_ws, fc1_ws, fc2_ws = [], [], [], []
    for i in range(DEPTH):
        k0, k1, k2, k3 = jax.random.split(keys[2 + i], 4)
        w = nrm(k0, (EMBED_DIM, 3 * EMBED_DIM))
        # fold attention scale into the Q output columns (bias is zero anyway)
        w = w.at[:, :EMBED_DIM].multiply(attn_scale)
        # zero-pad QKV output width 96 -> 128 (full-lane matmul output)
        w = jnp.pad(w, ((0, 0), (0, QKV_PAD - 3 * EMBED_DIM)))
        qkv_ws.append(w.astype(bf16))
        proj_ws.append(nrm(k1, (EMBED_DIM, EMBED_DIM)).astype(bf16))
        fc1_ws.append(nrm(k2, (EMBED_DIM, FFN_DIM)).astype(bf16))
        fc2_ws.append(nrm(k3, (FFN_DIM, EMBED_DIM)).astype(bf16))

    return {
        'patch_w': patch_w,
        'embed_const': embed_const,
        'key_bias': jnp.asarray(key_bias),
        'bd_mask': jnp.asarray(bd_mask),
        'final_norm': jnp.concatenate(
            [jnp.ones((1, EMBED_DIM), jnp.float32),
             jnp.zeros((1, EMBED_DIM), jnp.float32)], axis=0),
        'vec_slab': jnp.asarray(vec),
        'qkv_w': jnp.stack(qkv_ws),      # (DEPTH, D, 128)   bf16
        'proj_w': jnp.stack(proj_ws),    # (DEPTH, D, D)     bf16
        'fc1_w': jnp.stack(fc1_ws),      # (DEPTH, D, FFN)   bf16
        'fc2_w': jnp.stack(fc2_ws),      # (DEPTH, FFN, D)   bf16
    }


def data2vec_multi_forward(source, params):
    """Data2VecMultiModel.forward(source, mask=False, features_only=True,
    remove_extra_tokens=True) — eval mode (dropout / layerdrop inactive)."""
    b = source.shape[0]
    patches = patchify(source)                                 # (B, N, C*p*p)

    kern = partial(fused_forward_kernel, num_heads=NUM_HEADS, eps=NORM_EPS,
                   n_patches=N_PATCHES, depth=DEPTH)

    def whole(shape):
        # grid-invariant whole-array operand (DMA'd once, reused every step)
        return pl.BlockSpec(shape, lambda bb, _n=len(shape): (0,) * _n)

    # NOTE: at real EAT dims (D~768, FFN~3072, depth 12) the whole-weight set
    # would not fit VMEM; switch the weights back to a depth-indexed streaming
    # BlockSpec and set pltpu.CompilerParams(vmem_limit_bytes=...) there.
    x_out, lr_out = pl.pallas_call(
        kern,
        out_shape=(
            jax.ShapeDtypeStruct((b, N_PATCHES, EMBED_DIM), jnp.float32),
            jax.ShapeDtypeStruct((b, DEPTH, SEQ_PAD, EMBED_DIM), jnp.float32),
        ),
        grid_spec=pltpu.PrefetchScalarGridSpec(
            num_scalar_prefetch=0,
            grid=(b,),                                         # batch only
            in_specs=[
                pl.BlockSpec((None, N_PATCHES, PATCH_DIM), lambda bb: (bb, 0, 0)),
                whole((PATCH_DIM, EMBED_DIM)),                 # patch_w
                whole((SEQ_PAD, EMBED_DIM)),                   # embed_const
                whole((1, HT)),                                # key_bias
                whole((HT, EMBED_DIM)),                        # bd_mask
                whole((2, EMBED_DIM)),                         # final_norm
                whole((DEPTH, 8, QKV_PAD)),                    # vec_slab
                whole((DEPTH, EMBED_DIM, QKV_PAD)),            # qkv_w
                whole((DEPTH, EMBED_DIM, EMBED_DIM)),          # proj_w
                whole((DEPTH, EMBED_DIM, FFN_DIM)),            # fc1_w
                whole((DEPTH, FFN_DIM, EMBED_DIM)),            # fc2_w
            ],
            out_specs=(
                pl.BlockSpec((None, N_PATCHES, EMBED_DIM), lambda bb: (bb, 0, 0)),
                pl.BlockSpec((None, DEPTH, SEQ_PAD, EMBED_DIM),
                             lambda bb: (bb, 0, 0, 0)),
            ),
        ),
        compiler_params=pltpu.CompilerParams(
            dimension_semantics=("parallel",)),                # v7x: 1 batch / TC
    )(patches,
      params['patch_w'], params['embed_const'], params['key_bias'],
      params['bd_mask'], params['final_norm'], params['vec_slab'],
      params['qkv_w'], params['proj_w'], params['fc1_w'], params['fc2_w'])

    # restore the reference token order [CLS | patches] and drop padding rows
    layer_results = []
    for i in range(DEPTH):
        lr = lr_out[:, i]
        layer_results.append(jnp.concatenate(
            [lr[:, N_PATCHES:SEQ, :], lr[:, :N_PATCHES, :]], axis=1))
    return {'x': x_out, 'padding_mask': None,
            'layer_results': layer_results, 'mask': None}
    # TODO(synk): EMA teacher, masking/clone_batch and the d2v/recon/cls losses
    # are training-time, stateful/RNG-driven paths and are not implemented here.


if __name__ == "__main__":
    key = jax.random.PRNGKey(0)
    k_src, k_par = jax.random.split(key)
    source = jax.random.normal(k_src, (B, IN_CHANS, IMG, IMG), dtype=jnp.float32)
    params = init_params(k_par)

    fwd = jax.jit(data2vec_multi_forward)
    out = fwd(source, params)
    jax.block_until_ready(out['x'])

    assert out['x'].shape == (B, N_PATCHES, EMBED_DIM)
    assert len(out['layer_results']) == DEPTH
    assert out['layer_results'][0].shape == (B, SEQ, EMBED_DIM)
    assert bool(jnp.all(jnp.isfinite(out['x'])))
    assert bool(jnp.all(jnp.isfinite(out['layer_results'][-1])))
    print("KERNEL_OK")
</pallas_src>

<mosaic_0001>
module attributes {stable_mosaic.version = 11 : i64} {
  func.func @fused_forward_kernel(%arg0: i32, %arg1: memref<1x16x16xf32, #tpu.memory_space<vmem>>, %arg2: memref<16x32xbf16, #tpu.memory_space<vmem>>, %arg3: memref<24x32xf32, #tpu.memory_space<vmem>>, %arg4: memref<1x96xf32, #tpu.memory_space<vmem>>, %arg5: memref<96x32xf32, #tpu.memory_space<vmem>>, %arg6: memref<2x32xf32, #tpu.memory_space<vmem>>, %arg7: memref<2x8x128xf32, #tpu.memory_space<vmem>>, %arg8: memref<2x32x128xbf16, #tpu.memory_space<vmem>>, %arg9: memref<2x32x32xbf16, #tpu.memory_space<vmem>>, %arg10: memref<2x32x128xbf16, #tpu.memory_space<vmem>>, %arg11: memref<2x128x32xbf16, #tpu.memory_space<vmem>>, %arg12: memref<1x16x32xf32, #tpu.memory_space<vmem>>, %arg13: memref<1x2x24x32xf32, #tpu.memory_space<vmem>>) attributes {dimension_semantics = [#tpu.dimension_semantics<parallel>], iteration_bounds = array<i64: 2>, scalar_prefetch = 0 : i64, scratch_operands = 0 : i64, tpu.core_type = #tpu.core_type<tc>, window_params = [{transform_indices = @transform_0, window_bounds = array<i64: 1, 16, 16>}, {pipeline_mode = #tpu.pipeline_mode<synchronous>, transform_indices = @transform_1, window_bounds = array<i64: 16, 32>}, {pipeline_mode = #tpu.pipeline_mode<synchronous>, transform_indices = @transform_2, window_bounds = array<i64: 24, 32>}, {pipeline_mode = #tpu.pipeline_mode<synchronous>, transform_indices = @transform_3, window_bounds = array<i64: 1, 96>}, {pipeline_mode = #tpu.pipeline_mode<synchronous>, transform_indices = @transform_4, window_bounds = array<i64: 96, 32>}, {pipeline_mode = #tpu.pipeline_mode<synchronous>, transform_indices = @transform_5, window_bounds = array<i64: 2, 32>}, {pipeline_mode = #tpu.pipeline_mode<synchronous>, transform_indices = @transform_6, window_bounds = array<i64: 2, 8, 128>}, {pipeline_mode = #tpu.pipeline_mode<synchronous>, transform_indices = @transform_7, window_bounds = array<i64: 2, 32, 128>}, {pipeline_mode = #tpu.pipeline_mode<synchronous>, transform_indices = @transform_8, window_bounds = array<i64: 2, 32, 32>}, {pipeline_mode = #tpu.pipeline_mode<synchronous>, transform_indices = @transform_9, window_bounds = array<i64: 2, 32, 128>}, {pipeline_mode = #tpu.pipeline_mode<synchronous>, transform_indices = @transform_10, window_bounds = array<i64: 2, 128, 32>}, {transform_indices = @transform_11, window_bounds = array<i64: 1, 16, 32>}, {transform_indices = @transform_12, window_bounds = array<i64: 1, 2, 24, 32>}]} {
    %c0 = arith.constant 0 : index
    %c0_0 = arith.constant 0 : index
    %c0_1 = arith.constant 0 : index
    %0 = vector.load %arg1[%c0, %c0_0, %c0_1] : memref<1x16x16xf32, #tpu.memory_space<vmem>>, vector<1x16x16xf32>
    %1 = vector.shape_cast %0 : vector<1x16x16xf32> to vector<16x16xf32>
    %c0_2 = arith.constant 0 : index
    %c0_3 = arith.constant 0 : index
    %2 = vector.load %arg2[%c0_2, %c0_3] : memref<16x32xbf16, #tpu.memory_space<vmem>>, vector<16x32xbf16>
    %3 = arith.truncf %1 : vector<16x16xf32> to vector<16x16xbf16>
    %cst = arith.constant dense<0.000000e+00> : vector<16x32xf32>
    %4 = tpu.matmul %3, %2, %cst {dimension_numbers = #tpu.dot_dimension_numbers<[1], [0], [0], [1], [0, 0, 1, 1], [], []>} : vector<16x16xbf16>, vector<16x32xbf16>, vector<16x32xf32> -> vector<16x32xf32>
    %cst_4 = arith.constant 0.000000e+00 : f32
    %5 = vector.broadcast %cst_4 : f32 to vector<8x32xf32>
    %6 = tpu.concatenate %4, %5 in 0 : vector<16x32xf32>, vector<8x32xf32> -> vector<24x32xf32>
    %c0_5 = arith.constant 0 : index
    %c0_6 = arith.constant 0 : index
    %7 = vector.load %arg3[%c0_5, %c0_6] : memref<24x32xf32, #tpu.memory_space<vmem>>, vector<24x32xf32>
    %8 = arith.addf %6, %7 : vector<24x32xf32>
    %c0_7 = arith.constant 0 : index
    %c0_8 = arith.constant 0 : index
    %9 = vector.load %arg4[%c0_7, %c0_8] : memref<1x96xf32, #tpu.memory_space<vmem>>, vector<1x96xf32>
    %c0_9 = arith.constant 0 : index
    %c0_10 = arith.constant 0 : index
    %10 = vector.load %arg5[%c0_9, %c0_10] : memref<96x32xf32, #tpu.memory_space<vmem>>, vector<96x32xf32>
    %c0_11 = arith.constant 0 : index
    %c0_12 = arith.constant 0 : index
    %c0_13 = arith.constant 0 : index
    %11 = vector.load %arg7[%c0_11, %c0_12, %c0_13] : memref<2x8x128xf32, #tpu.memory_space<vmem>>, vector<1x8x128xf32>
    %12 = vector.shape_cast %11 : vector<1x8x128xf32> to vector<8x128xf32>
    %13 = vector.extract_strided_slice %12 {offsets = [0, 0], sizes = [1, 32], strides = [1, 1]} : vector<8x128xf32> to vector<1x32xf32>
    %14 = vector.extract_strided_slice %12 {offsets = [1, 0], sizes = [1, 32], strides = [1, 1]} : vector<8x128xf32> to vector<1x32xf32>
    %15 = vector.extract_strided_slice %12 {offsets = [2, 0], sizes = [1, 32], strides = [1, 1]} : vector<8x128xf32> to vector<1x32xf32>
    %16 = vector.extract_strided_slice %12 {offsets = [3, 0], sizes = [1, 32], strides = [1, 1]} : vector<8x128xf32> to vector<1x32xf32>
    %17 = vector.extract_strided_slice %12 {offsets = [4, 0], sizes = [1, 32], strides = [1, 1]} : vector<8x128xf32> to vector<1x32xf32>
    %18 = vector.extract_strided_slice %12 {offsets = [5, 0], sizes = [1, 32], strides = [1, 1]} : vector<8x128xf32> to vector<1x32xf32>
    %19 = vector.extract_strided_slice %12 {offsets = [6, 0], sizes = [1, 128], strides = [1, 1]} : vector<8x128xf32> to vector<1x128xf32>
    %20 = vector.extract_strided_slice %12 {offsets = [7, 0], sizes = [1, 128], strides = [1, 1]} : vector<8x128xf32> to vector<1x128xf32>
    %cst_14 = arith.constant dense<0.000000e+00> : vector<24xf32>
    %21 = vector.multi_reduction <add>, %8, %cst_14 [1] : vector<24x32xf32> to vector<24xf32>
    %22 = vector.shape_cast %21 : vector<24xf32> to vector<24x1xf32>
    %cst_15 = arith.constant 3.200000e+01 : f32
    %23 = vector.broadcast %cst_15 : f32 to vector<24x1xf32>
    %24 = arith.divf %22, %23 : vector<24x1xf32>
    %25 = vector.broadcast %24 : vector<24x1xf32> to vector<24x32xf32>
    %26 = arith.subf %8, %25 : vector<24x32xf32>
    %27 = arith.mulf %26, %26 : vector<24x32xf32>
    %cst_16 = arith.constant dense<0.000000e+00> : vector<24xf32>
    %28 = vector.multi_reduction <add>, %27, %cst_16 [1] : vector<24x32xf32> to vector<24xf32>
    %29 = vector.shape_cast %28 : vector<24xf32> to vector<24x1xf32>
    %cst_17 = arith.constant 3.200000e+01 : f32
    %30 = vector.broadcast %cst_17 : f32 to vector<24x1xf32>
    %31 = arith.divf %29, %30 : vector<24x1xf32>
    %32 = vector.broadcast %24 : vector<24x1xf32> to vector<24x32xf32>
    %33 = arith.subf %8, %32 : vector<24x32xf32>
    %cst_18 = arith.constant 9.99999997E-7 : f32
    %34 = vector.broadcast %cst_18 : f32 to vector<24x1xf32>
    %35 = arith.addf %31, %34 : vector<24x1xf32>
    %36 = math.rsqrt %35 : vector<24x1xf32>
    %37 = vector.broadcast %36 : vector<24x1xf32> to vector<24x32xf32>
    %38 = arith.mulf %33, %37 : vector<24x32xf32>
    %39 = vector.broadcast %13 : vector<1x32xf32> to vector<24x32xf32>
    %40 = arith.mulf %38, %39 : vector<24x32xf32>
    %41 = vector.broadcast %14 : vector<1x32xf32> to vector<24x32xf32>
    %42 = arith.addf %40, %41 : vector<24x32xf32>
    %c0_19 = arith.constant 0 : index
    %c0_20 = arith.constant 0 : index
    %c0_21 = arith.constant 0 : index
    %43 = vector.load %arg8[%c0_19, %c0_20, %c0_21] : memref<2x32x128xbf16, #tpu.memory_space<vmem>>, vector<1x32x128xbf16>
    %44 = vector.shape_cast %43 : vector<1x32x128xbf16> to vector<32x128xbf16>
    %45 = arith.truncf %42 : vector<24x32xf32> to vector<24x32xbf16>
    %cst_22 = arith.constant dense<0.000000e+00> : vector<24x128xf32>
    %46 = tpu.matmul %45, %44, %cst_22 {dimension_numbers = #tpu.dot_dimension_numbers<[1], [0], [0], [1], [0, 0, 1, 1], [], []>} : vector<24x32xbf16>, vector<32x128xbf16>, vector<24x128xf32> -> vector<24x128xf32>
    %47 = vector.broadcast %19 : vector<1x128xf32> to vector<24x128xf32>
    %48 = arith.addf %46, %47 : vector<24x128xf32>
    %49 = vector.extract_strided_slice %48 {offsets = [0, 0], sizes = [24, 32], strides = [1, 1]} : vector<24x128xf32> to vector<24x32xf32>
    %50 = vector.extract_strided_slice %48 {offsets = [0, 32], sizes = [24, 32], strides = [1, 1]} : vector<24x128xf32> to vector<24x32xf32>
    %51 = vector.extract_strided_slice %48 {offsets = [0, 64], sizes = [24, 32], strides = [1, 1]} : vector<24x128xf32> to vector<24x32xf32>
    %52 = tpu.concatenate %50, %50, %50, %50 in 0 : vector<24x32xf32>, vector<24x32xf32>, vector<24x32xf32>, vector<24x32xf32> -> vector<96x32xf32>
    %53 = arith.mulf %52, %10 : vector<96x32xf32>
    %54 = tpu.concatenate %51, %51, %51, %51 in 0 : vector<24x32xf32>, vector<24x32xf32>, vector<24x32xf32>, vector<24x32xf32> -> vector<96x32xf32>
    %55 = arith.mulf %54, %10 : vector<96x32xf32>
    %56 = arith.truncf %49 : vector<24x32xf32> to vector<24x32xbf16>
    %57 = arith.truncf %53 : vector<96x32xf32> to vector<96x32xbf16>
    "tpu.trace_start"() <{level = 10 : i32, message = "td,rd->tr"}> : () -> ()
    %cst_23 = arith.constant dense<0.000000e+00> : vector<24x96xf32>
    %58 = tpu.matmul %56, %57, %cst_23 {dimension_numbers = #tpu.dot_dimension_numbers<[1], [1], [0], [0], [0, 0, 1, 0], [], []>} : vector<24x32xbf16>, vector<96x32xbf16>, vector<24x96xf32> -> vector<24x96xf32>
    "tpu.trace_stop"() : () -> ()
    %59 = vector.broadcast %9 : vector<1x96xf32> to vector<24x96xf32>
    %60 = arith.addf %58, %59 : vector<24x96xf32>
    %cst_24 = arith.constant dense<0xFF800000> : vector<24xf32>
    %61 = vector.multi_reduction <maximumf>, %60, %cst_24 [1] : vector<24x96xf32> to vector<24xf32>
    %62 = vector.shape_cast %61 : vector<24xf32> to vector<24x1xf32>
    %63 = vector.broadcast %62 : vector<24x1xf32> to vector<24x96xf32>
    %64 = arith.subf %60, %63 : vector<24x96xf32>
    %65 = math.exp %64 : vector<24x96xf32>
    %cst_25 = arith.constant dense<0.000000e+00> : vector<24x32xf32>
    %66 = tpu.matmul %65, %10, %cst_25 {dimension_numbers = #tpu.dot_dimension_numbers<[1], [0], [0], [1], [0, 0, 1, 1], [], []>} : vector<24x96xf32>, vector<96x32xf32>, vector<24x32xf32> -> vector<24x32xf32>
    %67 = arith.truncf %65 : vector<24x96xf32> to vector<24x96xbf16>
    %68 = arith.truncf %55 : vector<96x32xf32> to vector<96x32xbf16>
    "tpu.trace_start"() <{level = 10 : i32, message = "tr,rc->tc"}> : () -> ()
    %cst_26 = arith.constant dense<0.000000e+00> : vector<24x32xf32>
    %69 = tpu.matmul %67, %68, %cst_26 {dimension_numbers = #tpu.dot_dimension_numbers<[1], [0], [0], [1], [0, 0, 1, 1], [], []>} : vector<24x96xbf16>, vector<96x32xbf16>, vector<24x32xf32> -> vector<24x32xf32>
    "tpu.trace_stop"() : () -> ()
    %70 = tpu.reciprocal %66 {approx = true} : vector<24x32xf32> -> vector<24x32xf32>
    %71 = arith.mulf %69, %70 : vector<24x32xf32>
    %c0_27 = arith.constant 0 : index
    %c0_28 = arith.constant 0 : index
    %c0_29 = arith.constant 0 : index
    %72 = vector.load %arg9[%c0_27, %c0_28, %c0_29] : memref<2x32x32xbf16, #tpu.memory_space<vmem>>, vector<1x32x32xbf16>
    %73 = vector.shape_cast %72 : vector<1x32x32xbf16> to vector<32x32xbf16>
    %74 = arith.truncf %71 : vector<24x32xf32> to vector<24x32xbf16>
    %cst_30 = arith.constant dense<0.000000e+00> : vector<24x32xf32>
    %75 = tpu.matmul %74, %73, %cst_30 {dimension_numbers = #tpu.dot_dimension_numbers<[1], [0], [0], [1], [0, 0, 1, 1], [], []>} : vector<24x32xbf16>, vector<32x32xbf16>, vector<24x32xf32> -> vector<24x32xf32>
    %76 = arith.addf %8, %75 : vector<24x32xf32>
    %77 = vector.broadcast %17 : vector<1x32xf32> to vector<24x32xf32>
    %78 = arith.addf %76, %77 : vector<24x32xf32>
    %cst_31 = arith.constant dense<0.000000e+00> : vector<24xf32>
    %79 = vector.multi_reduction <add>, %78, %cst_31 [1] : vector<24x32xf32> to vector<24xf32>
    %80 = vector.shape_cast %79 : vector<24xf32> to vector<24x1xf32>
    %cst_32 = arith.constant 3.200000e+01 : f32
    %81 = vector.broadcast %cst_32 : f32 to vector<24x1xf32>
    %82 = arith.divf %80, %81 : vector<24x1xf32>
    %83 = vector.broadcast %82 : vector<24x1xf32> to vector<24x32xf32>
    %84 = arith.subf %78, %83 : vector<24x32xf32>
    %85 = arith.mulf %84, %84 : vector<24x32xf32>
    %cst_33 = arith.constant dense<0.000000e+00> : vector<24xf32>
    %86 = vector.multi_reduction <add>, %85, %cst_33 [1] : vector<24x32xf32> to vector<24xf32>
    %87 = vector.shape_cast %86 : vector<24xf32> to vector<24x1xf32>
    %cst_34 = arith.constant 3.200000e+01 : f32
    %88 = vector.broadcast %cst_34 : f32 to vector<24x1xf32>
    %89 = arith.divf %87, %88 : vector<24x1xf32>
    %90 = vector.broadcast %82 : vector<24x1xf32> to vector<24x32xf32>
    %91 = arith.subf %78, %90 : vector<24x32xf32>
    %cst_35 = arith.constant 9.99999997E-7 : f32
    %92 = vector.broadcast %cst_35 : f32 to vector<24x1xf32>
    %93 = arith.addf %89, %92 : vector<24x1xf32>
    %94 = math.rsqrt %93 : vector<24x1xf32>
    %95 = vector.broadcast %94 : vector<24x1xf32> to vector<24x32xf32>
    %96 = arith.mulf %91, %95 : vector<24x32xf32>
    %97 = vector.broadcast %15 : vector<1x32xf32> to vector<24x32xf32>
    %98 = arith.mulf %96, %97 : vector<24x32xf32>
    %99 = vector.broadcast %16 : vector<1x32xf32> to vector<24x32xf32>
    %100 = arith.addf %98, %99 : vector<24x32xf32>
    %c0_36 = arith.constant 0 : index
    %c0_37 = arith.constant 0 : index
    %c0_38 = arith.constant 0 : index
    %101 = vector.load %arg10[%c0_36, %c0_37, %c0_38] : memref<2x32x128xbf16, #tpu.memory_space<vmem>>, vector<1x32x128xbf16>
    %102 = vector.shape_cast %101 : vector<1x32x128xbf16> to vector<32x128xbf16>
    %103 = arith.truncf %100 : vector<24x32xf32> to vector<24x32xbf16>
    %cst_39 = arith.constant dense<0.000000e+00> : vector<24x128xf32>
    %104 = tpu.matmul %103, %102, %cst_39 {dimension_numbers = #tpu.dot_dimension_numbers<[1], [0], [0], [1], [0, 0, 1, 1], [], []>} : vector<24x32xbf16>, vector<32x128xbf16>, vector<24x128xf32> -> vector<24x128xf32>
    %105 = vector.broadcast %20 : vector<1x128xf32> to vector<24x128xf32>
    %106 = arith.addf %104, %105 : vector<24x128xf32>
    %107 = arith.mulf %106, %106 : vector<24x128xf32>
    %108 = arith.mulf %106, %107 : vector<24x128xf32>
    %cst_40 = arith.constant 4.471500e-02 : f32
    %109 = vector.broadcast %cst_40 : f32 to vector<24x128xf32>
    %110 = arith.mulf %109, %108 : vector<24x128xf32>
    %111 = arith.addf %106, %110 : vector<24x128xf32>
    %cst_41 = arith.constant 0.797884583 : f32
    %112 = vector.broadcast %cst_41 : f32 to vector<24x128xf32>
    %113 = arith.mulf %112, %111 : vector<24x128xf32>
    %114 = math.tanh %113 : vector<24x128xf32>
    %cst_42 = arith.constant 1.000000e+00 : f32
    %115 = vector.broadcast %cst_42 : f32 to vector<24x128xf32>
    %116 = arith.addf %115, %114 : vector<24x128xf32>
    %cst_43 = arith.constant 5.000000e-01 : f32
    %117 = vector.broadcast %cst_43 : f32 to vector<24x128xf32>
    %118 = arith.mulf %117, %116 : vector<24x128xf32>
    %119 = arith.mulf %106, %118 : vector<24x128xf32>
    %c0_44 = arith.constant 0 : index
    %c0_45 = arith.constant 0 : index
    %c0_46 = arith.constant 0 : index
    %120 = vector.load %arg11[%c0_44, %c0_45, %c0_46] : memref<2x128x32xbf16, #tpu.memory_space<vmem>>, vector<1x128x32xbf16>
    %121 = vector.shape_cast %120 : vector<1x128x32xbf16> to vector<128x32xbf16>
    %122 = arith.truncf %119 : vector<24x128xf32> to vector<24x128xbf16>
    %cst_47 = arith.constant dense<0.000000e+00> : vector<24x32xf32>
    %123 = tpu.matmul %122, %121, %cst_47 {dimension_numbers = #tpu.dot_dimension_numbers<[1], [0], [0], [1], [0, 0, 1, 1], [], []>} : vector<24x128xbf16>, vector<128x32xbf16>, vector<24x32xf32> -> vector<24x32xf32>
    %124 = vector.broadcast %18 : vector<1x32xf32> to vector<24x32xf32>
    %125 = arith.addf %123, %124 : vector<24x32xf32>
    %c0_48 = arith.constant 0 : index
    %c0_49 = arith.constant 0 : index
    %c0_50 = arith.constant 0 : index
    %c0_51 = arith.constant 0 : index
    %126 = vector.load %arg13[%c0_48, %c0_49, %c0_50, %c0_51] : memref<1x2x24x32xf32, #tpu.memory_space<vmem>>, vector<1x1x24x32xf32>
    %127 = vector.shape_cast %126 : vector<1x1x24x32xf32> to vector<24x32xf32>
    %128 = vector.shape_cast %125 : vector<24x32xf32> to vector<1x1x24x32xf32>
    tpu.vector_store %arg13[%c0_48, %c0_49, %c0_50, %c0_51], %128 {strides = array<i32>} : memref<1x2x24x32xf32, #tpu.memory_space<vmem>>, vector<1x1x24x32xf32>,
    %129 = arith.addf %78, %125 : vector<24x32xf32>
    %c1 = arith.constant 1 : index
    %c0_52 = arith.constant 0 : index
    %c0_53 = arith.constant 0 : index
    %130 = vector.load %arg7[%c1, %c0_52, %c0_53] : memref<2x8x128xf32, #tpu.memory_space<vmem>>, vector<1x8x128xf32>
    %131 = vector.shape_cast %130 : vector<1x8x128xf32> to vector<8x128xf32>
    %132 = vector.extract_strided_slice %131 {offsets = [0, 0], sizes = [1, 32], strides = [1, 1]} : vector<8x128xf32> to vector<1x32xf32>
    %133 = vector.extract_strided_slice %131 {offsets = [1, 0], sizes = [1, 32], strides = [1, 1]} : vector<8x128xf32> to vector<1x32xf32>
    %134 = vector.extract_strided_slice %131 {offsets = [2, 0], sizes = [1, 32], strides = [1, 1]} : vector<8x128xf32> to vector<1x32xf32>
    %135 = vector.extract_strided_slice %131 {offsets = [3, 0], sizes = [1, 32], strides = [1, 1]} : vector<8x128xf32> to vector<1x32xf32>
    %136 = vector.extract_strided_slice %131 {offsets = [4, 0], sizes = [1, 32], strides = [1, 1]} : vector<8x128xf32> to vector<1x32xf32>
    %137 = vector.extract_strided_slice %131 {offsets = [5, 0], sizes = [1, 32], strides = [1, 1]} : vector<8x128xf32> to vector<1x32xf32>
    %138 = vector.extract_strided_slice %131 {offsets = [6, 0], sizes = [1, 128], strides = [1, 1]} : vector<8x128xf32> to vector<1x128xf32>
    %139 = vector.extract_strided_slice %131 {offsets = [7, 0], sizes = [1, 128], strides = [1, 1]} : vector<8x128xf32> to vector<1x128xf32>
    %cst_54 = arith.constant dense<0.000000e+00> : vector<24xf32>
    %140 = vector.multi_reduction <add>, %129, %cst_54 [1] : vector<24x32xf32> to vector<24xf32>
    %141 = vector.shape_cast %140 : vector<24xf32> to vector<24x1xf32>
    %cst_55 = arith.constant 3.200000e+01 : f32
    %142 = vector.broadcast %cst_55 : f32 to vector<24x1xf32>
    %143 = arith.divf %141, %142 : vector<24x1xf32>
    %144 = vector.broadcast %143 : vector<24x1xf32> to vector<24x32xf32>
    %145 = arith.subf %129, %144 : vector<24x32xf32>
    %146 = arith.mulf %145, %145 : vector<24x32xf32>
    %cst_56 = arith.constant dense<0.000000e+00> : vector<24xf32>
    %147 = vector.multi_reduction <add>, %146, %cst_56 [1] : vector<24x32xf32> to vector<24xf32>
    %148 = vector.shape_cast %147 : vector<24xf32> to vector<24x1xf32>
    %cst_57 = arith.constant 3.200000e+01 : f32
    %149 = vector.broadcast %cst_57 : f32 to vector<24x1xf32>
    %150 = arith.divf %148, %149 : vector<24x1xf32>
    %151 = vector.broadcast %143 : vector<24x1xf32> to vector<24x32xf32>
    %152 = arith.subf %129, %151 : vector<24x32xf32>
    %cst_58 = arith.constant 9.99999997E-7 : f32
    %153 = vector.broadcast %cst_58 : f32 to vector<24x1xf32>
    %154 = arith.addf %150, %153 : vector<24x1xf32>
    %155 = math.rsqrt %154 : vector<24x1xf32>
    %156 = vector.broadcast %155 : vector<24x1xf32> to vector<24x32xf32>
    %157 = arith.mulf %152, %156 : vector<24x32xf32>
    %158 = vector.broadcast %132 : vector<1x32xf32> to vector<24x32xf32>
    %159 = arith.mulf %157, %158 : vector<24x32xf32>
    %160 = vector.broadcast %133 : vector<1x32xf32> to vector<24x32xf32>
    %161 = arith.addf %159, %160 : vector<24x32xf32>
    %c1_59 = arith.constant 1 : index
    %c0_60 = arith.constant 0 : index
    %c0_61 = arith.constant 0 : index
    %162 = vector.load %arg8[%c1_59, %c0_60, %c0_61] : memref<2x32x128xbf16, #tpu.memory_space<vmem>>, vector<1x32x128xbf16>
    %163 = vector.shape_cast %162 : vector<1x32x128xbf16> to vector<32x128xbf16>
    %164 = arith.truncf %161 : vector<24x32xf32> to vector<24x32xbf16>
    %cst_62 = arith.constant dense<0.000000e+00> : vector<24x128xf32>
    %165 = tpu.matmul %164, %163, %cst_62 {dimension_numbers = #tpu.dot_dimension_numbers<[1], [0], [0], [1], [0, 0, 1, 1], [], []>} : vector<24x32xbf16>, vector<32x128xbf16>, vector<24x128xf32> -> vector<24x128xf32>
    %166 = vector.broadcast %138 : vector<1x128xf32> to vector<24x128xf32>
    %167 = arith.addf %165, %166 : vector<24x128xf32>
    %168 = vector.extract_strided_slice %167 {offsets = [0, 0], sizes = [24, 32], strides = [1, 1]} : vector<24x128xf32> to vector<24x32xf32>
    %169 = vector.extract_strided_slice %167 {offsets = [0, 32], sizes = [24, 32], strides = [1, 1]} : vector<24x128xf32> to vector<24x32xf32>
    %170 = vector.extract_strided_slice %167 {offsets = [0, 64], sizes = [24, 32], strides = [1, 1]} : vector<24x128xf32> to vector<24x32xf32>
    %171 = tpu.concatenate %169, %169, %169, %169 in 0 : vector<24x32xf32>, vector<24x32xf32>, vector<24x32xf32>, vector<24x32xf32> -> vector<96x32xf32>
    %172 = arith.mulf %171, %10 : vector<96x32xf32>
    %173 = tpu.concatenate %170, %170, %170, %170 in 0 : vector<24x32xf32>, vector<24x32xf32>, vector<24x32xf32>, vector<24x32xf32> -> vector<96x32xf32>
    %174 = arith.mulf %173, %10 : vector<96x32xf32>
    %175 = arith.truncf %168 : vector<24x32xf32> to vector<24x32xbf16>
    %176 = arith.truncf %172 : vector<96x32xf32> to vector<96x32xbf16>
    "tpu.trace_start"() <{level = 10 : i32, message = "td,rd->tr"}> : () -> ()
    %cst_63 = arith.constant dense<0.000000e+00> : vector<24x96xf32>
    %177 = tpu.matmul %175, %176, %cst_63 {dimension_numbers = #tpu.dot_dimension_numbers<[1], [1], [0], [0], [0, 0, 1, 0], [], []>} : vector<24x32xbf16>, vector<96x32xbf16>, vector<24x96xf32> -> vector<24x96xf32>
    "tpu.trace_stop"() : () -> ()
    %178 = vector.broadcast %9 : vector<1x96xf32> to vector<24x96xf32>
    %179 = arith.addf %177, %178 : vector<24x96xf32>
    %cst_64 = arith.constant dense<0xFF800000> : vector<24xf32>
    %180 = vector.multi_reduction <maximumf>, %179, %cst_64 [1] : vector<24x96xf32> to vector<24xf32>
    %181 = vector.shape_cast %180 : vector<24xf32> to vector<24x1xf32>
    %182 = vector.broadcast %181 : vector<24x1xf32> to vector<24x96xf32>
    %183 = arith.subf %179, %182 : vector<24x96xf32>
    %184 = math.exp %183 : vector<24x96xf32>
    %cst_65 = arith.constant dense<0.000000e+00> : vector<24x32xf32>
    %185 = tpu.matmul %184, %10, %cst_65 {dimension_numbers = #tpu.dot_dimension_numbers<[1], [0], [0], [1], [0, 0, 1, 1], [], []>} : vector<24x96xf32>, vector<96x32xf32>, vector<24x32xf32> -> vector<24x32xf32>
    %186 = arith.truncf %184 : vector<24x96xf32> to vector<24x96xbf16>
    %187 = arith.truncf %174 : vector<96x32xf32> to vector<96x32xbf16>
    "tpu.trace_start"() <{level = 10 : i32, message = "tr,rc->tc"}> : () -> ()
    %cst_66 = arith.constant dense<0.000000e+00> : vector<24x32xf32>
    %188 = tpu.matmul %186, %187, %cst_66 {dimension_numbers = #tpu.dot_dimension_numbers<[1], [0], [0], [1], [0, 0, 1, 1], [], []>} : vector<24x96xbf16>, vector<96x32xbf16>, vector<24x32xf32> -> vector<24x32xf32>
    "tpu.trace_stop"() : () -> ()
    %189 = tpu.reciprocal %185 {approx = true} : vector<24x32xf32> -> vector<24x32xf32>
    %190 = arith.mulf %188, %189 : vector<24x32xf32>
    %c1_67 = arith.constant 1 : index
    %c0_68 = arith.constant 0 : index
    %c0_69 = arith.constant 0 : index
    %191 = vector.load %arg9[%c1_67, %c0_68, %c0_69] : memref<2x32x32xbf16, #tpu.memory_space<vmem>>, vector<1x32x32xbf16>
    %192 = vector.shape_cast %191 : vector<1x32x32xbf16> to vector<32x32xbf16>
    %193 = arith.truncf %190 : vector<24x32xf32> to vector<24x32xbf16>
    %cst_70 = arith.constant dense<0.000000e+00> : vector<24x32xf32>
    %194 = tpu.matmul %193, %192, %cst_70 {dimension_numbers = #tpu.dot_dimension_numbers<[1], [0], [0], [1], [0, 0, 1, 1], [], []>} : vector<24x32xbf16>, vector<32x32xbf16>, vector<24x32xf32> -> vector<24x32xf32>
    %195 = arith.addf %129, %194 : vector<24x32xf32>
    %196 = vector.broadcast %136 : vector<1x32xf32> to vector<24x32xf32>
    %197 = arith.addf %195, %196 : vector<24x32xf32>
    %cst_71 = arith.constant dense<0.000000e+00> : vector<24xf32>
    %198 = vector.multi_reduction <add>, %197, %cst_71 [1] : vector<24x32xf32> to vector<24xf32>
    %199 = vector.shape_cast %198 : vector<24xf32> to vector<24x1xf32>
    %cst_72 = arith.constant 3.200000e+01 : f32
    %200 = vector.broadcast %cst_72 : f32 to vector<24x1xf32>
    %201 = arith.divf %199, %200 : vector<24x1xf32>
    %202 = vector.broadcast %201 : vector<24x1xf32> to vector<24x32xf32>
    %203 = arith.subf %197, %202 : vector<24x32xf32>
    %204 = arith.mulf %203, %203 : vector<24x32xf32>
    %cst_73 = arith.constant dense<0.000000e+00> : vector<24xf32>
    %205 = vector.multi_reduction <add>, %204, %cst_73 [1] : vector<24x32xf32> to vector<24xf32>
    %206 = vector.shape_cast %205 : vector<24xf32> to vector<24x1xf32>
    %cst_74 = arith.constant 3.200000e+01 : f32
    %207 = vector.broadcast %cst_74 : f32 to vector<24x1xf32>
    %208 = arith.divf %206, %207 : vector<24x1xf32>
    %209 = vector.broadcast %201 : vector<24x1xf32> to vector<24x32xf32>
    %210 = arith.subf %197, %209 : vector<24x32xf32>
    %cst_75 = arith.constant 9.99999997E-7 : f32
    %211 = vector.broadcast %cst_75 : f32 to vector<24x1xf32>
    %212 = arith.addf %208, %211 : vector<24x1xf32>
    %213 = math.rsqrt %212 : vector<24x1xf32>
    %214 = vector.broadcast %213 : vector<24x1xf32> to vector<24x32xf32>
    %215 = arith.mulf %210, %214 : vector<24x32xf32>
    %216 = vector.broadcast %134 : vector<1x32xf32> to vector<24x32xf32>
    %217 = arith.mulf %215, %216 : vector<24x32xf32>
    %218 = vector.broadcast %135 : vector<1x32xf32> to vector<24x32xf32>
    %219 = arith.addf %217, %218 : vector<24x32xf32>
    %c1_76 = arith.constant 1 : index
    %c0_77 = arith.constant 0 : index
    %c0_78 = arith.constant 0 : index
    %220 = vector.load %arg10[%c1_76, %c0_77, %c0_78] : memref<2x32x128xbf16, #tpu.memory_space<vmem>>, vector<1x32x128xbf16>
    %221 = vector.shape_cast %220 : vector<1x32x128xbf16> to vector<32x128xbf16>
    %222 = arith.truncf %219 : vector<24x32xf32> to vector<24x32xbf16>
    %cst_79 = arith.constant dense<0.000000e+00> : vector<24x128xf32>
    %223 = tpu.matmul %222, %221, %cst_79 {dimension_numbers = #tpu.dot_dimension_numbers<[1], [0], [0], [1], [0, 0, 1, 1], [], []>} : vector<24x32xbf16>, vector<32x128xbf16>, vector<24x128xf32> -> vector<24x128xf32>
    %224 = vector.broadcast %139 : vector<1x128xf32> to vector<24x128xf32>
    %225 = arith.addf %223, %224 : vector<24x128xf32>
    %226 = arith.mulf %225, %225 : vector<24x128xf32>
    %227 = arith.mulf %225, %226 : vector<24x128xf32>
    %cst_80 = arith.constant 4.471500e-02 : f32
    %228 = vector.broadcast %cst_80 : f32 to vector<24x128xf32>
    %229 = arith.mulf %228, %227 : vector<24x128xf32>
    %230 = arith.addf %225, %229 : vector<24x128xf32>
    %cst_81 = arith.constant 0.797884583 : f32
    %231 = vector.broadcast %cst_81 : f32 to vector<24x128xf32>
    %232 = arith.mulf %231, %230 : vector<24x128xf32>
    %233 = math.tanh %232 : vector<24x128xf32>
    %cst_82 = arith.constant 1.000000e+00 : f32
    %234 = vector.broadcast %cst_82 : f32 to vector<24x128xf32>
    %235 = arith.addf %234, %233 : vector<24x128xf32>
    %cst_83 = arith.constant 5.000000e-01 : f32
    %236 = vector.broadcast %cst_83 : f32 to vector<24x128xf32>
    %237 = arith.mulf %236, %235 : vector<24x128xf32>
    %238 = arith.mulf %225, %237 : vector<24x128xf32>
    %c1_84 = arith.constant 1 : index
    %c0_85 = arith.constant 0 : index
    %c0_86 = arith.constant 0 : index
    %239 = vector.load %arg11[%c1_84, %c0_85, %c0_86] : memref<2x128x32xbf16, #tpu.memory_space<vmem>>, vector<1x128x32xbf16>
    %240 = vector.shape_cast %239 : vector<1x128x32xbf16> to vector<128x32xbf16>
    %241 = arith.truncf %238 : vector<24x128xf32> to vector<24x128xbf16>
    %cst_87 = arith.constant dense<0.000000e+00> : vector<24x32xf32>
    %242 = tpu.matmul %241, %240, %cst_87 {dimension_numbers = #tpu.dot_dimension_numbers<[1], [0], [0], [1], [0, 0, 1, 1], [], []>} : vector<24x128xbf16>, vector<128x32xbf16>, vector<24x32xf32> -> vector<24x32xf32>
    %243 = vector.broadcast %137 : vector<1x32xf32> to vector<24x32xf32>
    %244 = arith.addf %242, %243 : vector<24x32xf32>
    %c0_88 = arith.constant 0 : index
    %c1_89 = arith.constant 1 : index
    %c0_90 = arith.constant 0 : index
    %c0_91 = arith.constant 0 : index
    %245 = vector.load %arg13[%c0_88, %c1_89, %c0_90, %c0_91] : memref<1x2x24x32xf32, #tpu.memory_space<vmem>>, vector<1x1x24x32xf32>
    %246 = vector.shape_cast %245 : vector<1x1x24x32xf32> to vector<24x32xf32>
    %247 = vector.shape_cast %244 : vector<24x32xf32> to vector<1x1x24x32xf32>
    tpu.vector_store %arg13[%c0_88, %c1_89, %c0_90, %c0_91], %247 {strides = array<i32>} : memref<1x2x24x32xf32, #tpu.memory_space<vmem>>, vector<1x1x24x32xf32>,
    %248 = arith.addf %197, %244 : vector<24x32xf32>
    %c0_92 = arith.constant 0 : index
    %c0_93 = arith.constant 0 : index
    %249 = vector.load %arg6[%c0_92, %c0_93] : memref<2x32xf32, #tpu.memory_space<vmem>>, vector<2x32xf32>
    %250 = vector.extract_strided_slice %249 {offsets = [0, 0], sizes = [1, 32], strides = [1, 1]} : vector<2x32xf32> to vector<1x32xf32>
    %251 = vector.extract_strided_slice %249 {offsets = [1, 0], sizes = [1, 32], strides = [1, 1]} : vector<2x32xf32> to vector<1x32xf32>
    %cst_94 = arith.constant dense<0.000000e+00> : vector<24xf32>
    %252 = vector.multi_reduction <add>, %248, %cst_94 [1] : vector<24x32xf32> to vector<24xf32>
    %253 = vector.shape_cast %252 : vector<24xf32> to vector<24x1xf32>
    %cst_95 = arith.constant 3.200000e+01 : f32
    %254 = vector.broadcast %cst_95 : f32 to vector<24x1xf32>
    %255 = arith.divf %253, %254 : vector<24x1xf32>
    %256 = vector.broadcast %255 : vector<24x1xf32> to vector<24x32xf32>
    %257 = arith.subf %248, %256 : vector<24x32xf32>
    %258 = arith.mulf %257, %257 : vector<24x32xf32>
    %cst_96 = arith.constant dense<0.000000e+00> : vector<24xf32>
    %259 = vector.multi_reduction <add>, %258, %cst_96 [1] : vector<24x32xf32> to vector<24xf32>
    %260 = vector.shape_cast %259 : vector<24xf32> to vector<24x1xf32>
    %cst_97 = arith.constant 3.200000e+01 : f32
    %261 = vector.broadcast %cst_97 : f32 to vector<24x1xf32>
    %262 = arith.divf %260, %261 : vector<24x1xf32>
    %263 = vector.broadcast %255 : vector<24x1xf32> to vector<24x32xf32>
    %264 = arith.subf %248, %263 : vector<24x32xf32>
    %cst_98 = arith.constant 9.99999997E-7 : f32
    %265 = vector.broadcast %cst_98 : f32 to vector<24x1xf32>
    %266 = arith.addf %262, %265 : vector<24x1xf32>
    %267 = math.rsqrt %266 : vector<24x1xf32>
    %268 = vector.broadcast %267 : vector<24x1xf32> to vector<24x32xf32>
    %269 = arith.mulf %264, %268 : vector<24x32xf32>
    %270 = vector.broadcast %250 : vector<1x32xf32> to vector<24x32xf32>
    %271 = arith.mulf %269, %270 : vector<24x32xf32>
    %272 = vector.broadcast %251 : vector<1x32xf32> to vector<24x32xf32>
    %273 = arith.addf %271, %272 : vector<24x32xf32>
    %274 = vector.extract_strided_slice %273 {offsets = [0, 0], sizes = [16, 32], strides = [1, 1]} : vector<24x32xf32> to vector<16x32xf32>
    %c0_99 = arith.constant 0 : index
    %c0_100 = arith.constant 0 : index
    %c0_101 = arith.constant 0 : index
    %275 = vector.load %arg12[%c0_99, %c0_100, %c0_101] : memref<1x16x32xf32, #tpu.memory_space<vmem>>, vector<1x16x32xf32>
    %276 = vector.shape_cast %275 : vector<1x16x32xf32> to vector<16x32xf32>
    %277 = vector.shape_cast %274 : vector<16x32xf32> to vector<1x16x32xf32>
    tpu.vector_store %arg12[%c0_99, %c0_100, %c0_101], %277 {strides = array<i32>} : memref<1x16x32xf32, #tpu.memory_space<vmem>>, vector<1x16x32xf32>,
    return
  }
  func.func @transform_0(%arg0: i32) -> (i32, i32, i32) {
    %c0_i32 = arith.constant 0 : i32
    %c0_i32_0 = arith.constant 0 : i32
    %c0_i32_1 = arith.constant 0 : i32
    return %arg0, %c0_i32, %c0_i32_0 : i32, i32, i32
  }
  func.func @transform_1(%arg0: i32) -> (i32, i32) {
    %c0_i32 = arith.constant 0 : i32
    %c0_i32_0 = arith.constant 0 : i32
    %c0_i32_1 = arith.constant 0 : i32
    return %c0_i32, %c0_i32_0 : i32, i32
  }
  func.func @transform_2(%arg0: i32) -> (i32, i32) {
    %c0_i32 = arith.constant 0 : i32
    %c0_i32_0 = arith.constant 0 : i32
    %c0_i32_1 = arith.constant 0 : i32
    return %c0_i32, %c0_i32_0 : i32, i32
  }
  func.func @transform_3(%arg0: i32) -> (i32, i32) {
    %c0_i32 = arith.constant 0 : i32
    %c0_i32_0 = arith.constant 0 : i32
    %c0_i32_1 = arith.constant 0 : i32
    return %c0_i32, %c0_i32_0 : i32, i32
  }
  func.func @transform_4(%arg0: i32) -> (i32, i32) {
    %c0_i32 = arith.constant 0 : i32
    %c0_i32_0 = arith.constant 0 : i32
    %c0_i32_1 = arith.constant 0 : i32
    return %c0_i32, %c0_i32_0 : i32, i32
  }
  func.func @transform_5(%arg0: i32) -> (i32, i32) {
    %c0_i32 = arith.constant 0 : i32
    %c0_i32_0 = arith.constant 0 : i32
    %c0_i32_1 = arith.constant 0 : i32
    return %c0_i32, %c0_i32_0 : i32, i32
  }
  func.func @transform_6(%arg0: i32) -> (i32, i32, i32) {
    %c0_i32 = arith.constant 0 : i32
    %c0_i32_0 = arith.constant 0 : i32
    %c0_i32_1 = arith.constant 0 : i32
    %c0_i32_2 = arith.constant 0 : i32
    return %c0_i32, %c0_i32_0, %c0_i32_1 : i32, i32, i32
  }
  func.func @transform_7(%arg0: i32) -> (i32, i32, i32) {
    %c0_i32 = arith.constant 0 : i32
    %c0_i32_0 = arith.constant 0 : i32
    %c0_i32_1 = arith.constant 0 : i32
    %c0_i32_2 = arith.constant 0 : i32
    return %c0_i32, %c0_i32_0, %c0_i32_1 : i32, i32, i32
  }
  func.func @transform_8(%arg0: i32) -> (i32, i32, i32) {
    %c0_i32 = arith.constant 0 : i32
    %c0_i32_0 = arith.constant 0 : i32
    %c0_i32_1 = arith.constant 0 : i32
    %c0_i32_2 = arith.constant 0 : i32
    return %c0_i32, %c0_i32_0, %c0_i32_1 : i32, i32, i32
  }
  func.func @transform_9(%arg0: i32) -> (i32, i32, i32) {
    %c0_i32 = arith.constant 0 : i32
    %c0_i32_0 = arith.constant 0 : i32
    %c0_i32_1 = arith.constant 0 : i32
    %c0_i32_2 = arith.constant 0 : i32
    return %c0_i32, %c0_i32_0, %c0_i32_1 : i32, i32, i32
  }
  func.func @transform_10(%arg0: i32) -> (i32, i32, i32) {
    %c0_i32 = arith.constant 0 : i32
    %c0_i32_0 = arith.constant 0 : i32
    %c0_i32_1 = arith.constant 0 : i32
    %c0_i32_2 = arith.constant 0 : i32
    return %c0_i32, %c0_i32_0, %c0_i32_1 : i32, i32, i32
  }
  func.func @transform_11(%arg0: i32) -> (i32, i32, i32) {
    %c0_i32 = arith.constant 0 : i32
    %c0_i32_0 = arith.constant 0 : i32
    %c0_i32_1 = arith.constant 0 : i32
    return %arg0, %c0_i32, %c0_i32_0 : i32, i32, i32
  }
  func.func @transform_12(%arg0: i32) -> (i32, i32, i32, i32) {
    %c0_i32 = arith.constant 0 : i32
    %c0_i32_0 = arith.constant 0 : i32
    %c0_i32_1 = arith.constant 0 : i32
    %c0_i32_2 = arith.constant 0 : i32
    return %arg0, %c0_i32, %c0_i32_0, %c0_i32_1 : i32, i32, i32, i32
  }
}

</mosaic_0001>

<bundles_post_ra>
// kernel: data2vec_multi_forward.1
= control target key start
LH: loop header
LB: loop body
LE: loop exit
PB: predicated region body
PF: predicated region fallthrough
CT: control target
= control target key end

     0   :  { %s3922_s0 = inlined_call_operand.vmem [shape: f32[2,16,16], index: 0, kind: input, shape index: {}]   ;;  %s3923_s1 = inlined_call_operand.vmem [shape: bf16[16,32], index: 1, kind: input, shape index: {}]   ;;  %s3924_s2 = inlined_call_operand.vmem [shape: f32[24,32], index: 2, kind: input, shape index: {}]   ;;  %s3925_s3 = inlined_call_operand.vmem [shape: f32[1,96], index: 3, kind: input, shape index: {}]   ;;  %s3926_s4 = inlined_call_operand.vmem [shape: f32[96,32], index: 4, kind: input, shape index: {}]   ;;  %s3927_s5 = inlined_call_operand.vmem [shape: f32[2,32], index: 5, kind: input, shape index: {}]   ;;  %s3928_s6 = inlined_call_operand.vmem [shape: f32[2,8,128], index: 6, kind: input, shape index: {}]   ;;  %s3929_s7 = inlined_call_operand.vmem [shape: bf16[2,32,128], index: 7, kind: input, shape index: {}]   ;;  %s3930_s8 = inlined_call_operand.vmem [shape: bf16[2,32,32], index: 8, kind: input, shape index: {}]   ;;  %s3931_s9 = inlined_call_operand.vmem [shape: bf16[2,32,128], index: 9, kind: input, shape index: {}]   ;;  %s3932_s10 = inlined_call_operand.vmem [shape: bf16[2,128,32], index: 10, kind: input, shape index: {}]   ;;  %s3933_s11 = inlined_call_operand.hbm [shape: f32[2,16,32], index: 11, kind: output, shape index: {0}]   ;;  %s3934_s12 = inlined_call_operand.vmem [shape: f32[2,2,24,32], index: 12, kind: output, shape index: {1}]  }
   0x1   :  { %3941 = sst [smem:[#allocation5_spill]] %s3922_s0 }
   0x2   :  { %18 = vsyncpa [#allocation3], 0 }
   0x3   :  { %20 = vsyncpa [#allocation3 + $0x1], 0  ;;  %s3138_s21 = smov 0   ;;  %s3140_s22 = smov 0  }
   0x4   :  { %s3142_s23 = smov 0   ;;  %s3144_s24 = smov 0  }
   0x5 LB: > { %s3159_s25 = sadd.s32 4294967295, %s3062_s24   ;;  %s2375_s26 = sadd.s32 4294967294, %s3062_s24   ;;  %s3062_s24 = sphi %s3144_s24, %s3953_s24   ;;  %s3058_s23 = sphi %s3142_s23, %s3952_s23   ;;  %s3054_s22 = sphi %s3140_s22, %s3951_s22   ;;  %s3050_s21 = sphi %s3138_s21, %s3950_s21  }
   0x6   : > { %s3163_s27 = sadd.s32 1, %s3062_s24   ;;  %s269_s28 = sadd.s32 1, %s3058_s23 }
   0x7   : > { %s266_s29 = ssub.s32 %s3062_s24, %s3163_s27  ;;  %p279_p0 = scmp.ne.s32.totalorder %s3058_s23, %s3054_s22 }
   0x8   : > { %p267_p1 = scmp.eq.s32.totalorder %s266_s29, 0  ;;  %p280_p2 = scmp.eq.s32.totalorder %s3159_s25, 1 }
   0x9   : > { %p285_p3 = scmp.ne.s32.totalorder %s3054_s22, %s3050_s21  ;;  %p286_p4 = scmp.eq.s32.totalorder %s2375_s26, 1 }
   0xa   : > { %s3174_s30 = scalar_select %p267_p1, %s3058_s23, %s269_s28  }
   0xb   : > { %p3176_p5 = por %p280_p2, %p279_p0  ;;  %p3180_p6 = por %p286_p4, %p285_p3 }
   0xc   : > { %p2378_p7 = scmp.ge.s32.totalorder %s3062_s24, 1  ;;  %p368_p8 = scmp.lt.s32.totalorder %s3062_s24, 3 }
   0xe   : > { %p369_p9 = pnand %p2378_p7, %p368_p8 }
   0xf   : > { %v2907_v0 = vld [vmem:[%s3923_s1] sm:$0xff] (!%p369_p9)   ;;  %v3064_v1 = vmov (!%p369_p9), 0.0   ;;  %p415_p10 = scmp.lt.s32.totalorder (!%p369_p9), %s3159_s25, 1  ;;  %vm3065_vm0 = vmmov (!%p369_p9), 0   ;;  %s3944_s0 = sld [smem:[#allocation5_spill]] (!%p369_p9)  ;;  %vm437_vm1 = vcmask (!%p369_p9), 130048   ;;  %v543_v53 = vlaneseq (!%p369_p9) }
  0x10   : > { %372 = sbr.rel (%p369_p9) target bundleno = 5222 (0x1466), region = 64  ;;  %2587 = vmatprep.subr.bf16.mxu0 (!%p369_p9), %v3064_v1  ;;  %2589 = vmatprep.mubr.msk.bf16.mxu0 (!%p369_p9), %vm3065_vm0, %v3064_v1  ;;  %vm502_vm2 = vcmask (!%p369_p9), 261120   ;;  %v3205_v5 = vld [vmem:[%s3924_s2 + $0x10] sm:$0xff] (!%p369_p9)  ;;  %v482_v7 = vld [vmem:[%s3924_s2] sm:$0xff] (!%p369_p9)  ;;  %v483_v9 = vld [vmem:[%s3924_s2 + $0x8] sm:$0xff] (!%p369_p9)  ;;  %s3067_s16 = smov (!%p369_p9), 96  }
  0x11   : > { %2588 = vmatpush3.bf16.msra.mxu0 (!%p369_p9), %v2907_v0  ;;  %2641 = vmatprep.mubr.msk.f32.mxu1 (!%p369_p9), %vm3065_vm0, %v3064_v1  ;;  %v509_v6 = vsel (!%p369_p9), %vm502_vm2, %v3205_v5, 0.0  ;;  %v2908_v32 = vld [vmem:[%s3929_s7] sm:$0xff] (!%p369_p9)   ;;  %v2909_v33 = vld [vmem:[%s3929_s7 + $0x8] sm:$0xff] (!%p369_p9)   ;;  %v3253_v36 = vld [vmem:[%s3926_s4 + $0x10] sm:$0xff] (!%p369_p9)  ;;  %v3311_v56 = vshrl.u32 (!%p369_p9), %v543_v53, 7  ;;  %vm845_vm3 = vcmask (!%p369_p9), 785408  }
  0x12   : > { %510 = vadd.xlane.f32.xlu1 (!%p369_p9), %v509_v6  ;;  %2593 = vmatprep.subr.bf16.mxu0 (!%p369_p9), %v2908_v32  ;;  %v3242_v34 = vld [vmem:[%s3926_s4 + $0x8] sm:$0xff] (!%p369_p9)  ;;  %v3248_v35 = vld [vmem:[%s3926_s4] sm:$0xff] (!%p369_p9)  ;;  %v3265_v38 = vld [vmem:[%s3926_s4 + $0x18] sm:$0xff] (!%p369_p9)  ;;  %s2478_s29 = sshll.u32 (!%p369_p9), %s3159_s25, 8 }
  0x13   : > { %v3259_v37 = vld [vmem:[%s3926_s4 + $0x20] sm:$0xff] (!%p369_p9)  ;;  %v3271_v39 = vld [vmem:[%s3926_s4 + $0x30] sm:$0xff] (!%p369_p9)  ;;  %v3277_v40 = vld [vmem:[%s3926_s4 + $0x28] sm:$0xff] (!%p369_p9)  ;;  %v3314_v57 = vsub.s32 (!%p369_p9), 0, %v3311_v56  ;;  %v3324_v62 = vsub.s32 (!%p369_p9), 1, %v3311_v56 }
  0x14   : > { %v3283_v41 = vld [vmem:[%s3926_s4 + $0x40] sm:$0xff] (!%p369_p9)  ;;  %v3289_v42 = vld [vmem:[%s3926_s4 + $0x38] sm:$0xff] (!%p369_p9)  ;;  %v3295_v43 = vld [vmem:[%s3926_s4 + $0x50] sm:$0xff] (!%p369_p9) }
  0x15   : > { %v3301_v44 = vld [vmem:[%s3926_s4 + $0x48] sm:$0xff] (!%p369_p9)  ;;  %v3308_v45 = vld [vmem:[%s3926_s4 + $0x58] sm:$0xff] (!%p369_p9)  ;;  %v3319_v58 = vld [vmem:[%s3928_s6] sm:$0xff] (!%p369_p9) }
  0x16   : > { %v546_v61 = vrot.slane (!%p369_p9), %v3319_v58, %v3314_v57  ;;  %v553_v6 = vrot.slane (!%p369_p9), %v3319_v58, %v3324_v62 }
  0x17   : > { %s3194_s17 = scalar_select %p415_p10, %s3159_s25, 1 }
  0x19   : > { %s2477_s18 = sshll.u32 %s3194_s17, 4  ;;  %s2859_s28 = smul.u32 48, %s3194_s17 }
  0x1a   : > { %s419_s26 = scalar_lea.vmem %s3944_s0, %s2477_s18  ;;  %s3066_s18 = smov 32  }
  0x1b   : > { %v426_v2 = vld [vmem:[%s419_s26] sm:$0xff]  ;;  %v427_v3 = vld [vmem:[%s419_s26 + $0x8] sm:$0xff]  ;;  %s3935_s0 = smov 64  }
  0x1c   : > { %v430_v4 = vpack.c.bf16 %v427_v3, %v426_v2 }
  0x1e   : > { %2590 = vmatmul.mubr.msk.bf16.vlgmr.msra.gmra.mrb[0].mxu0 %vm437_vm1, %v430_v4 }
  0x1f   : > { %2594 = vmatpush3.bf16.msra.mxu0 %v2908_v32 }
  0x20   : > { %2595 = vmatprep.subr.bf16.mxu0 %v2909_v33 }
  0x23   : > { %2596 = vmatpush3.bf16.msra.mxu0 %v2909_v33 }
  0x9f   : > { %v511_v17 = vpop.xlane.xlu1 %510 }
  0xa0   : > { %v515_v18 = vmul.f32 0.03125, %v511_v17 }
  0xa2   : > { %v3224_v21 = vsub.f32 %v3205_v5, %v515_v18 }
  0xa4   : > { %v521_v26 = vmul.f32 %v3224_v21, %v3224_v21 }
  0xa6   : > { %v528_v29 = vsel %vm502_vm2, %v521_v26, 0.0 }
  0xf1   : > { %v475_v8 = vpop.f32.mrb[0].mxu0 }
  0xf2   : > { %v3215_v10 = vadd.f32 %v482_v7, %v475_v8  ;;  %v2591_v11 = vpop.f32.mrb[1].mxu0 }
  0xf3   : > { %v478_v12 = vpop.f32.mrb[2].mxu0 }
  0xf4   : > { %v3217_v13 = vadd.f32 %v483_v9, %v478_v12  ;;  %v2592_v14 = vpop.f32.mrb[3].mxu0  ;;  %v503_v15 = vsel %vm502_vm2, %v3215_v10, 0.0 }
  0xf5   : > { %504 = vadd.xlane.f32.xlu0 %v503_v15 }
  0xf6   : > { %v506_v16 = vsel %vm502_vm2, %v3217_v13, 0.0 }
  0xf9   : > { %507 = vadd.xlane.f32.xlu0 %v506_v16 }
 0x182   : > { %v505_v19 = vpop.xlane.xlu0 %504 }
 0x183   : > { %v513_v20 = vmul.f32 0.03125, %v505_v19 }
 0x185   : > { %v516_v22 = vsub.f32 %v3215_v10, %v513_v20 }
 0x186   : > { %v508_v23 = vpop.xlane.xlu0 %507 }
 0x187   : > { %v514_v24 = vmul.f32 0.03125, %v508_v23  ;;  %v519_v25 = vmul.f32 %v516_v22, %v516_v22 }
 0x189   : > { %v517_v27 = vsub.f32 %v3217_v13, %v514_v24  ;;  %v522_v28 = vsel %vm502_vm2, %v519_v25, 0.0 }
 0x18a   : > { %523 = vadd.xlane.f32.xlu1 %v522_v28 }
 0x18b   : > { %v520_v30 = vmul.f32 %v517_v27, %v517_v27 }
 0x18d   : > { %v525_v31 = vsel %vm502_vm2, %v520_v30, 0.0 }
 0x18e   : > { %529 = vadd.xlane.f32.xlu1 %v528_v29  ;;  %526 = vadd.xlane.f32.xlu0 %v525_v31 }
 0x19f   : > { %647 = vrot.lane.b32.xlu1 %v3242_v34, %s3066_s18 }
 0x1a3   : > { %649 = vrot.lane.b32.xlu1 %v3253_v36, %s3066_s18 }
 0x1a4   : > { %645 = vrot.lane.b32.xlu0 %v3248_v35, %s3066_s18 }
 0x1a7   : > { %651 = vrot.lane.b32.xlu1 %v3265_v38, %s3066_s18 }
 0x1a8   : > { %653 = vrot.lane.b32.xlu0 %v3259_v37, %s3066_s18 }
 0x1ab   : > { %655 = vrot.lane.b32.xlu1 %v3277_v40, %s3066_s18 }
 0x1ac   : > { %657 = vrot.lane.b32.xlu0 %v3271_v39, %s3066_s18 }
 0x1af   : > { %659 = vrot.lane.b32.xlu1 %v3289_v42, %s3066_s18 }
 0x1b0   : > { %661 = vrot.lane.b32.xlu0 %v3283_v41, %s3066_s18 }
 0x1b3   : > { %663 = vrot.lane.b32.xlu1 %v3301_v44, %s3066_s18 }
 0x1b4   : > { %665 = vrot.lane.b32.xlu0 %v3295_v43, %s3066_s18 }
 0x1b7   : > { %667 = vrot.lane.b32.xlu1 %v3308_v45, %s3066_s18  ;;  %s3646_s18 = scalar_lea.vmem %s3934_s12, %s2859_s28  ;;  %s3070_s28 = smov [#allocation2]  }
 0x217   : > { %v524_v46 = vpop.xlane.xlu1 %523 }
 0x218   : > { %v531_v47 = vmul.f32 0.03125, %v524_v46 }
 0x21a   : > { %v534_v48 = vadd.f32 1e-06, %v531_v47 }
 0x21b   : > { %v530_v49 = vpop.xlane.xlu1 %529  ;;  %v527_v50 = vpop.xlane.xlu0 %526 }
 0x21c   : > { %2936 = vrsqrt.f32 %v534_v48  ;;  %v533_v51 = vmul.f32 0.03125, %v530_v49  ;;  %v532_v52 = vmul.f32 0.03125, %v527_v50 }
 0x21e   : > { %v536_v54 = vadd.f32 1e-06, %v533_v51  ;;  %v535_v55 = vadd.f32 1e-06, %v532_v52 }
 0x21f   : > { %v3331_v16 = vpop.permute.xlu1 %647  ;;  %v3335_v18 = vpop.permute.xlu0 %645 }
 0x220   : > { %2938 = vrsqrt.f32 %v536_v54 }
 0x221   : > { %2940 = vrsqrt.f32 %v535_v55 }
 0x223   : > { %v3333_v17 = vpop.permute.xlu1 %649  ;;  %v3339_v20 = vpop.permute.xlu0 %653 }
 0x226   : > { %v2937_v59 = vpop.eup %2936 }
 0x227   : > { %v540_v60 = vmul.f32 %v2937_v59, %v516_v22  ;;  %v3337_v19 = vpop.permute.xlu1 %651  ;;  %v565_v22 = vsub.s32 6, %v3311_v56  ;;  %v3344_v23 = vpop.permute.xlu0 %657 }
 0x229   : > { %v547_v4 = vmul.f32 %v546_v61, %v540_v60  ;;  %v566_v25 = vrot.slane %v3319_v58, %v565_v22 }
 0x22a   : > { %v2939_v63 = vpop.eup %2938 }
 0x22b   : > { %v2941_v0 = vpop.eup %2940  ;;  %v542_v2 = vmul.f32 %v2939_v63, %v3224_v21  ;;  %v554_v11 = vadd.f32 %v553_v6, %v547_v4  ;;  %v3341_v21 = vpop.permute.xlu1 %655 }
 0x22c   : > { %v541_v3 = vmul.f32 %v2941_v0, %v517_v27  ;;  %v3353_v28 = vpop.permute.xlu0 %661 }
 0x22d   : > { %v549_v7 = vmul.f32 %v546_v61, %v542_v2 }
 0x22e   : > { %v548_v8 = vmul.f32 %v546_v61, %v541_v3 }
 0x22f   : > { %v556_v9 = vadd.f32 %v553_v6, %v549_v7  ;;  %v3346_v24 = vpop.permute.xlu1 %659 }
 0x230   : > { %v555_v12 = vadd.f32 %v553_v6, %v548_v8  ;;  %v3371_v53 = vpop.permute.xlu0 %665 }
 0x231   : > { %v562_v14 = vpack.c.bf16 %v556_v9, %v556_v9 }
 0x232   : > { %v561_v15 = vpack.c.bf16 %v555_v12, %v554_v11 }
 0x233   : > { %v3357_v32 = vpop.permute.xlu1 %663 }
 0x234   : > { %2597 = vmatprep.mubr.msk.bf16.mxu0 %vm502_vm2, %v561_v15 }
 0x235   : > { %2598 = vmatmul.mubr.msk.bf16.vlgmr.msra.gmra.mrb[4].mxu0 %vm502_vm2, %v562_v14 }
 0x237   : > { %v3381_v61 = vpop.permute.xlu1 %667 }
 0x308   : > { %v2599_v26 = vpop.f32.mrb[4].mxu0 }
 0x309   : > { %v3351_v27 = vadd.f32 %v2599_v26, %v566_v25  ;;  %v619_v29 = vpop.f32.mrb[5].mxu0 }
 0x30a   : > { %v3355_v30 = vadd.f32 %v619_v29, %v566_v25  ;;  %v2600_v31 = vpop.f32.mrb[6].mxu0 }
 0x30b   : > { %v622_v33 = vpop.f32.mrb[7].mxu0  ;;  %v683_v46 = vmul.f32 %v3333_v17, %v3351_v27  ;;  %v686_v2 = vmul.f32 %v3341_v21, %v3351_v27  ;;  %v689_v3 = vmul.f32 %v3353_v28, %v3351_v27  ;;  %v692_v4 = vmul.f32 %v3381_v61, %v3351_v27 }
 0x30c   : > { %v3361_v47 = vadd.f32 %v622_v33, %v566_v25  ;;  %v684_v48 = vmul.f32 %v3337_v19, %v3355_v30  ;;  %v681_v51 = vmul.f32 %v3335_v18, %v3355_v30  ;;  %v687_v59 = vmul.f32 %v3344_v23, %v3355_v30 }
 0x30d   : > { %v690_v7 = vmul.f32 %v3357_v32, %v3355_v30 }
 0x30e   : > { %v741_v49 = vpack.c.bf16 %v3361_v47, %v3355_v30  ;;  %v744_v50 = vpack.c.bf16 %v684_v48, %v683_v46  ;;  %v682_v52 = vmul.f32 %v3331_v16, %v3361_v47  ;;  %v688_v54 = vmul.f32 %v3346_v24, %v3361_v47 }
 0x30f   : > { %v685_v60 = vmul.f32 %v3339_v20, %v3361_v47  ;;  %v691_v63 = vmul.f32 %v3371_v53, %v3361_v47  ;;  %v747_v9 = vpack.c.bf16 %v690_v7, %v689_v3  ;;  %v3461_v7 = vpack.c.bf16 %v3242_v34, %v3248_v35 }
 0x310   : > { %2613 = vmatprep.mubr.msk.bf16.mxu0 %vm502_vm2, %v741_v49  ;;  %763 = vrot.lane.b32.xlu1 %v744_v50, %s3067_s16  ;;  %v743_v55 = vpack.c.bf16 %v682_v52, %v681_v51  ;;  %v746_v0 = vpack.c.bf16 %v688_v54, %v687_v59 }
 0x311   : > { %v745_v6 = vpack.c.bf16 %v686_v2, %v685_v60  ;;  %v748_v8 = vpack.c.bf16 %v692_v4, %v691_v63 }
 0x312   : > { %761 = vrot.lane.b32.xlu0 %v743_v55, %s3067_s16 }
 0x314   : > { %767 = vrot.lane.b32.xlu1 %v746_v0, %s3067_s16 }
 0x316   : > { %765 = vrot.lane.b32.xlu0 %v745_v6, %s3067_s16  ;;  %v742_v6 = vpack.c.bf16 %v3351_v27, %v3351_v27 }
 0x318   : > { %771 = vrot.lane.b32.xlu1 %v748_v8, %s3067_s16  ;;  %v3069_v8 = vmov 0.0|0.0  }
 0x319   : > { %2811 = vmatprep.subr.bf16.mxu1 %v3069_v8 }
 0x31a   : > { %769 = vrot.lane.b32.xlu0 %v747_v9, %s3067_s16  ;;  %2813 = vmatpush3.bf16.msra.mxu1 %v3461_v7  ;;  %v3467_v9 = vpack.c.bf16 %v3265_v38, %v3253_v36 }
 0x31b   : > { %2814 = vmatprep.subr.bf16.mxu1 %v3069_v8 }
 0x31c   : > { %695 = vrot.lane.b32.xlu1 %v3242_v34, %s3935_s0  ;;  %v3479_v34 = vpack.c.bf16 %v3289_v42, %v3271_v39 }
 0x31e   : > { %693 = vrot.lane.b32.xlu0 %v3248_v35, %s3935_s0  ;;  %2816 = vmatpush3.bf16.msra.mxu1 %v3467_v9  ;;  %v3487_v35 = vld [vmem:[%s3925_s3] ss:$0 sm:$0xff] }
 0x31f   : > { %2817 = vmatprep.subr.bf16.mxu1 %v3069_v8 }
 0x320   : > { %699 = vrot.lane.b32.xlu1 %v3265_v38, %s3935_s0 }
 0x322   : > { %697 = vrot.lane.b32.xlu0 %v3253_v36, %s3935_s0 }
 0x324   : > { %703 = vrot.lane.b32.xlu1 %v3277_v40, %s3935_s0 }
 0x326   : > { %701 = vrot.lane.b32.xlu0 %v3259_v37, %s3935_s0 }
 0x328   : > { %707 = vrot.lane.b32.xlu1 %v3289_v42, %s3935_s0 }
 0x32a   : > { %705 = vrot.lane.b32.xlu0 %v3271_v39, %s3935_s0 }
 0x32c   : > { %711 = vrot.lane.b32.xlu1 %v3301_v44, %s3935_s0 }
 0x32e   : > { %709 = vrot.lane.b32.xlu0 %v3283_v41, %s3935_s0 }
 0x330   : > { %715 = vrot.lane.b32.xlu1 %v3308_v45, %s3935_s0 }
 0x332   : > { %713 = vrot.lane.b32.xlu0 %v3295_v43, %s3935_s0 }
 0x382   : > { %v764_v11 = vpop.permute.xlu1 %763 }
 0x383   : > { %v783_v31 = vsel %vm502_vm2, %v764_v11, 0 }
 0x384   : > { %v762_v12 = vpop.permute.xlu0 %761 }
 0x385   : > { %v780_v14 = vsel %vm502_vm2, %v762_v12, 0  ;;  %2847 = vmatprep.subr.msk.bf16.mxu0 %vm502_vm2, %v762_v12 }
 0x386   : > { %v768_v15 = vpop.permute.xlu1 %767  ;;  %2602 = vmatpush3.bf16.xpose.msra.mxu0 %v780_v14 }
 0x387   : > { %2848 = vmatprep.subr.msk.bf16.mxu0 %vm502_vm2, %v764_v11  ;;  %v789_v2 = vsel %vm502_vm2, %v768_v15, 0  ;;  %v3473_v11 = vpack.c.bf16 %v3277_v40, %v3259_v37 }
 0x388   : > { %v766_v25 = vpop.permute.xlu0 %765 }
 0x389   : > { %v786_v50 = vsel %vm502_vm2, %v766_v25, 0  ;;  %2819 = vmatpush3.bf16.msra.mxu1 %v3473_v11 }
 0x38a   : > { %v772_v26 = vpop.permute.xlu1 %771  ;;  %2820 = vmatprep.subr.bf16.mxu1 %v3069_v8 }
 0x38b   : > { %v795_v4 = vsel %vm502_vm2, %v772_v26, 0 }
 0x38c   : > { %v770_v29 = vpop.permute.xlu0 %769 }
 0x38d   : > { %v792_v3 = vsel %vm502_vm2, %v770_v29, 0  ;;  %2822 = vmatpush3.bf16.msra.mxu1 %v3479_v34 }
 0x38e   : > { %v3426_v33 = vpop.permute.xlu1 %695  ;;  %2604 = vmatpush3.bf16.xpose.msra.mxu0 %v783_v31  ;;  %2823 = vmatprep.subr.bf16.mxu1 %v3069_v8 }
 0x38f   : > { %2849 = vmatprep.subr.msk.bf16.mxu0 %vm502_vm2, %v766_v25 }
 0x390   : > { %v3429_v46 = vpop.permute.xlu0 %693 }
 0x392   : > { %v3431_v48 = vpop.permute.xlu1 %699 }
 0x393   : > { %v732_v51 = vmul.f32 %v3431_v48, %v3355_v30 }
 0x394   : > { %v3433_v49 = vpop.permute.xlu0 %697 }
 0x395   : > { %v731_v52 = vmul.f32 %v3433_v49, %v3351_v27 }
 0x396   : > { %v3440_v54 = vpop.permute.xlu1 %703  ;;  %2606 = vmatpush3.bf16.xpose.msra.mxu0 %v786_v50 }
 0x397   : > { %v956_v55 = vpack.c.bf16 %v732_v51, %v731_v52  ;;  %2850 = vmatprep.subr.msk.bf16.mxu0 %vm502_vm2, %v768_v15  ;;  %v734_v60 = vmul.f32 %v3440_v54, %v3351_v27 }
 0x398   : > { %v3443_v59 = vpop.permute.xlu0 %701 }
 0x399   : > { %v733_v63 = vmul.f32 %v3443_v59, %v3361_v47  ;;  %969 = vrot.lane.b32.xlu1 %v956_v55, %s3935_s0  ;;  %v3509_v55 = vpack.c.bf16 %v3301_v44, %v3283_v41 }
 0x39b   : > { %v957_v0 = vpack.c.bf16 %v734_v60, %v733_v63  ;;  %2825 = vmatpush3.bf16.msra.mxu1 %v3509_v55  ;;  %v729_v63 = vmul.f32 %v3429_v46, %v3355_v30 }
 0x39c   : > { %2826 = vmatprep.subr.bf16.mxu1 %v3069_v8 }
 0x39d   : > { %971 = vrot.lane.b32.xlu1 %v957_v0, %s3935_s0  ;;  %v3518_v0 = vpack.c.bf16 %v3308_v45, %v3295_v43 }
 0x39e   : > { %2608 = vmatpush3.bf16.xpose.msra.mxu0 %v789_v2  ;;  %v730_v2 = vmul.f32 %v3426_v33, %v3361_v47 }
 0x39f   : > { %2851 = vmatprep.subr.msk.bf16.mxu0 %vm502_vm2, %v770_v29  ;;  %v3497_v29 = vpop.permute.xlu1 %707  ;;  %2828 = vmatpush3.bf16.msra.mxu1 %v3518_v0 }
 0x3a0   : > { %v955_v41 = vpack.c.bf16 %v730_v2, %v729_v63 }
 0x3a3   : > { %v3501_v50 = vpop.permute.xlu1 %711 }
 0x3a4   : > { %v738_v52 = vmul.f32 %v3501_v50, %v3355_v30 }
 0x3a6   : > { %2610 = vmatpush3.bf16.xpose.msra.mxu0 %v792_v3 }
 0x3a7   : > { %2852 = vmatprep.subr.msk.bf16.mxu0 %vm502_vm2, %v772_v26  ;;  %v3495_v26 = vpop.permute.xlu0 %705 }
 0x3a8   : > { %v735_v44 = vmul.f32 %v3495_v26, %v3355_v30 }
 0x3ab   : > { %v3499_v31 = vpop.permute.xlu0 %709 }
 0x3ac   : > { %v737_v51 = vmul.f32 %v3499_v31, %v3351_v27 }
 0x3ae   : > { %2612 = vmatpush3.bf16.xpose.msra.mxu0 %v795_v4  ;;  %v959_v60 = vpack.c.bf16 %v738_v52, %v737_v51  ;;  %v736_v4 = vmul.f32 %v3497_v29, %v3361_v47 }
 0x3af   : > { %v3525_v3 = vpop.permute.xlu0 %713 }
 0x3b0   : > { %v958_v43 = vpack.c.bf16 %v736_v4, %v735_v44  ;;  %v739_v45 = vmul.f32 %v3525_v3, %v3361_v47 }
 0x3b5   : > { %2614 = vmatmul.mubr.msk.bf16.vlgmr.msra.gmra.mrb[8].mxu0 %vm502_vm2, %v742_v6  ;;  %v3530_v6 = vpop.permute.xlu1 %715 }
 0x40b   : > { %v970_v30 = vpop.permute.xlu1 %969 }
 0x488   : > { %v2615_v36 = vpop.f32.mrb[8].mxu0 }
 0x489   : > { %v840_v37 = vadd.f32 %v2615_v36, %v3487_v35  ;;  %v831_v38 = vpop.f32.mrb[9].mxu0  ;;  %v740_v36 = vmul.f32 %v3530_v6, %v3351_v27 }
 0x48a   : > { %v2616_v40 = vpop.f32.mrb[10].mxu0  ;;  %v832_v39 = vadd.f32 %v3487_v35, %v831_v38 }
 0x48b   : > { %v834_v42 = vpop.f32.mrb[11].mxu0  ;;  %v852_v12 = vsel %vm845_vm3, %v840_v37, -inf  ;;  %v960_v38 = vpack.c.bf16 %v740_v36, %v739_v45  ;;  %v972_v40 = vpop.permute.xlu1 %971  ;;  %v2910_v45 = vld [vmem:[%s3930_s8] sm:$0xff]   ;;  %v2911_v36 = vld [vmem:[%s3930_s8 + $0x8] sm:$0xff]  }
 0x48c   : > { %v835_v14 = vadd.f32 %v3487_v35, %v834_v42  ;;  %853 = vmax.xlane.f32.xlu0 %v852_v12  ;;  %v846_v25 = vsel %vm845_vm3, %v832_v39, -inf  ;;  %2666 = vmatprep.subr.bf16.mxu0 %v2910_v45 }
 0x48d   : > { %2667 = vmatpush3.bf16.msra.mxu0 %v2910_v45 }
 0x48e   : > { %v849_v15 = vsel %vm845_vm3, %v835_v14, -inf  ;;  %2668 = vmatprep.subr.bf16.mxu0 %v2911_v36 }
 0x48f   : > { %850 = vmax.xlane.f32.xlu1 %v849_v15 }
 0x490   : > { %847 = vmax.xlane.f32.xlu0 %v846_v25 }
 0x491   : > { %2669 = vmatpush3.bf16.msra.mxu0 %v2911_v36 }
 0x4a0   : > { %975 = vrot.lane.b32.xlu1 %v959_v60, %s3935_s0 }
 0x4a6   : > { %967 = vrot.lane.b32.xlu0 %v955_v41, %s3935_s0 }
 0x4aa   : > { %973 = vrot.lane.b32.xlu0 %v958_v43, %s3935_s0 }
 0x4ae   : > { %977 = vrot.lane.b32.xlu0 %v960_v38, %s3935_s0  ;;  %s3875_s0 = scalar_lea.hbm %s3933_s11, %s2478_s29 }
 0x519   : > { %v854_v42 = vpop.xlane.xlu0 %853 }
 0x51a   : > { %v857_v63 = vsub.f32 %v840_v37, %v854_v42 }
 0x51c   : > { %v851_v12 = vpop.xlane.xlu1 %850  ;;  %v862_v47 = vmul.f32 1.442695, %v857_v63 }
 0x51d   : > { %v848_v15 = vpop.xlane.xlu0 %847  ;;  %v856_v25 = vsub.f32 %v835_v14, %v851_v12 }
 0x51e   : > { %v855_v51 = vsub.f32 %v832_v39, %v848_v15 }
 0x51f   : > { %v860_v2 = vmul.f32 1.442695, %v856_v25 }
 0x520   : > { %v858_v52 = vmul.f32 1.442695, %v855_v51  ;;  %v976_v44 = vpop.permute.xlu1 %975 }
 0x521   : > { %v968_v60 = vpop.permute.xlu0 %967 }
 0x522   : > { %2942 = vpow2.f32 %v858_v52  ;;  %2650 = vmatprep.subr.bf16.mxu1 %v968_v60 }
 0x523   : > { %2944 = vpow2.f32 %v860_v2 }
 0x524   : > { %2946 = vpow2.f32 %v862_v47 }
 0x525   : > { %v974_v14 = vpop.permute.xlu0 %973 }
 0x529   : > { %v978_v4 = vpop.permute.xlu0 %977 }
 0x52c   : > { %v2943_v27 = vpop.eup %2942 }
 0x52d   : > { %2642 = vmatmul.mubr.msk.f32.vlgmr.msra.gmra.mrb[0].mxu1 %vm845_vm3, %v2943_v27  ;;  %v2945_v41 = vpop.eup %2944 }
 0x52e   : > { %2651 = vmatpush3.bf16.msra.mxu1 %v968_v60  ;;  %2644 = vmatprep.mubr.msk.f32.mxu1 %vm3065_vm0, %v3064_v1  ;;  %v2947_v37 = vpop.eup %2946  ;;  %v953_v39 = vpack.c.bf16 %v2945_v41, %v2943_v27 }
 0x52f   : > { %2652 = vmatprep.subr.bf16.mxu1 %v970_v30  ;;  %v954_v43 = vpack.c.bf16 %v2947_v37, %v2947_v37 }
 0x531   : > { %2645 = vmatmul.mubr.msk.f32.gmra.mrb[2].mxu1 %vm845_vm3, %v2945_v41 }
 0x532   : > { %2653 = vmatpush3.bf16.msra.mxu1 %v970_v30  ;;  %2647 = vmatprep.mubr.msk.f32.mxu1 %vm3065_vm0, %v3064_v1 }
 0x533   : > { %2654 = vmatprep.subr.bf16.mxu1 %v972_v40 }
 0x535   : > { %2648 = vmatmul.mubr.msk.f32.gmra.mrb[4].mxu1 %vm845_vm3, %v2947_v37 }
 0x536   : > { %2655 = vmatpush3.bf16.msra.mxu1 %v972_v40  ;;  %2662 = vmatprep.mubr.msk.bf16.mxu1 %vm845_vm3, %v953_v39 }
 0x537   : > { %2656 = vmatprep.subr.bf16.mxu1 %v974_v14 }
 0x53a   : > { %2657 = vmatpush3.bf16.msra.mxu1 %v974_v14 }
 0x53b   : > { %2658 = vmatprep.subr.bf16.mxu1 %v976_v44 }
 0x53e   : > { %2659 = vmatpush3.bf16.msra.mxu1 %v976_v44  ;;  %v3940_v44 = vsub.s32 4, %v3311_v56 }
 0x53f   : > { %2660 = vmatprep.subr.bf16.mxu1 %v978_v4 }
 0x542   : > { %2661 = vmatpush3.bf16.msra.mxu1 %v978_v4 }
 0x545   : > { %2663 = vmatmul.mubr.msk.bf16.vlgmr.msra.gmra.mrb[8].mxu1 %vm845_vm3, %v954_v43  ;;  %v1123_v43 = vrot.slane %v3319_v58, %v3940_v44 }
 0x600   : > { %v939_v38 = vpop.f32.mrb[0].mxu1 }
 0x601   : > { %v2643_v30 = vpop.f32.mrb[1].mxu1 }
 0x604   : > { %v944_v40 = vpop.f32.mrb[2].mxu1 }
 0x605   : > { %v2646_v42 = vpop.f32.mrb[3].mxu1 }
 0x608   : > { %v949_v12 = vpop.f32.mrb[4].mxu1 }
 0x609   : > { %v2649_v15 = vpop.f32.mrb[5].mxu1  ;;  %2948 = vrcp.f32 %v949_v12 }
 0x60a   : > { %2950 = vrcp.f32 %v939_v38 }
 0x60b   : > { %2952 = vrcp.f32 %v944_v40 }
 0x613   : > { %v2949_v25 = vpop.eup %2948 }
 0x614   : > { %v2951_v52 = vpop.eup %2950 }
 0x615   : > { %v2953_v27 = vpop.eup %2952 }
 0x618   : > { %v2664_v51 = vpop.f32.mrb[8].mxu1 }
 0x619   : > { %v1044_v60 = vmul.f32 %v2949_v25, %v2664_v51  ;;  %v1025_v63 = vpop.f32.mrb[9].mxu1 }
 0x61a   : > { %v1042_v2 = vmul.f32 %v2951_v52, %v1025_v63  ;;  %v2665_v47 = vpop.f32.mrb[10].mxu1 }
 0x61b   : > { %v1028_v41 = vpop.f32.mrb[11].mxu1  ;;  %v1050_v14 = vpack.c.bf16 %v1044_v60, %v1044_v60 }
 0x61c   : > { %v1043_v37 = vmul.f32 %v2953_v27, %v1028_v41 }
 0x61e   : > { %v1049_v39 = vpack.c.bf16 %v1043_v37, %v1042_v2 }
 0x620   : > { %2670 = vmatprep.mubr.msk.bf16.mxu0 %vm502_vm2, %v1049_v39 }
 0x621   : > { %2671 = vmatmul.mubr.msk.bf16.vlgmr.msra.gmra.mrb[12].mxu0 %vm502_vm2, %v1050_v14 }
 0x6f4   : > { %v2672_v4 = vpop.f32.mrb[12].mxu0 }
 0x6f5   : > { %v1103_v45 = vpop.f32.mrb[13].mxu0  ;;  %v1119_v40 = vadd.f32 %v2672_v4, %v3205_v5 }
 0x6f6   : > { %v1117_v36 = vadd.f32 %v1103_v45, %v3215_v10  ;;  %v2673_v38 = vpop.f32.mrb[14].mxu0 }
 0x6f7   : > { %v1106_v30 = vpop.f32.mrb[15].mxu0  ;;  %v3568_v51 = vadd.f32 %v1123_v43, %v1119_v40  ;;  %v2912_v38 = vld [vmem:[%s3931_s9] sm:$0xff]  }
 0x6f8   : > { %v3561_v42 = vadd.f32 %v1123_v43, %v1117_v36  ;;  %v1118_v12 = vadd.f32 %v1106_v30, %v3217_v13  ;;  %v2913_v30 = vld [vmem:[%s3931_s9 + $0x8] sm:$0xff]   ;;  %2674 = vmatprep.subr.bf16.mxu0 %v2912_v38 }
 0x6f9   : > { %v1133_v10 = vsel %vm502_vm2, %v3568_v51, 0.0  ;;  %2675 = vmatpush3.bf16.msra.mxu0 %v2912_v38 }
 0x6fa   : > { %v3564_v15 = vadd.f32 %v1123_v43, %v1118_v12  ;;  %v1127_v25 = vsel %vm502_vm2, %v3561_v42, 0.0  ;;  %2676 = vmatprep.subr.bf16.mxu0 %v2913_v30 }
 0x6fb   : > { %1128 = vadd.xlane.f32.xlu1 %v1127_v25 }
 0x6fc   : > { %v1130_v52 = vsel %vm502_vm2, %v3564_v15, 0.0 }
 0x6fd   : > { %1131 = vadd.xlane.f32.xlu0 %v1130_v52  ;;  %2677 = vmatpush3.bf16.msra.mxu0 %v2913_v30 }
 0x701   : > { %1134 = vadd.xlane.f32.xlu0 %v1133_v10 }
 0x788   : > { %v1129_v5 = vpop.xlane.xlu1 %1128 }
 0x789   : > { %v1136_v60 = vmul.f32 0.03125, %v1129_v5 }
 0x78a   : > { %v1132_v63 = vpop.xlane.xlu0 %1131 }
 0x78b   : > { %v1139_v13 = vsub.f32 %v3561_v42, %v1136_v60  ;;  %v1137_v2 = vmul.f32 0.03125, %v1132_v63 }
 0x78d   : > { %v1140_v47 = vsub.f32 %v3564_v15, %v1137_v2  ;;  %v1142_v27 = vmul.f32 %v1139_v13, %v1139_v13 }
 0x78e   : > { %v1135_v41 = vpop.xlane.xlu0 %1134 }
 0x78f   : > { %v1138_v37 = vmul.f32 0.03125, %v1135_v41  ;;  %v1145_v39 = vsel %vm502_vm2, %v1142_v27, 0.0  ;;  %v1143_v14 = vmul.f32 %v1140_v47, %v1140_v47  ;;  %v3939_v27 = vsub.s32 2, %v3311_v56 }
 0x790   : > { %1146 = vadd.xlane.f32.xlu0 %v1145_v39 }
 0x791   : > { %v1141_v4 = vsub.f32 %v3568_v51, %v1138_v37  ;;  %v1148_v43 = vsel %vm502_vm2, %v1143_v14, 0.0  ;;  %v1169_v41 = vrot.slane %v3319_v58, %v3939_v27  ;;  %v3937_v37 = vsub.s32 3, %v3311_v56 }
 0x792   : > { %1149 = vadd.xlane.f32.xlu1 %v1148_v43 }
 0x793   : > { %v1144_v45 = vmul.f32 %v1141_v4, %v1141_v4  ;;  %v1176_v38 = vrot.slane %v3319_v58, %v3937_v37 }
 0x795   : > { %v1151_v36 = vsel %vm502_vm2, %v1144_v45, 0.0 }
 0x796   : > { %1152 = vadd.xlane.f32.xlu0 %v1151_v36 }
 0x81d   : > { %v1147_v40 = vpop.xlane.xlu0 %1146 }
 0x81e   : > { %v1154_v12 = vmul.f32 0.03125, %v1147_v40 }
 0x81f   : > { %v1150_v25 = vpop.xlane.xlu1 %1149 }
 0x820   : > { %v1157_v52 = vadd.f32 1e-06, %v1154_v12  ;;  %v1155_v10 = vmul.f32 0.03125, %v1150_v25 }
 0x822   : > { %2954 = vrsqrt.f32 %v1157_v52  ;;  %v1158_v5 = vadd.f32 1e-06, %v1155_v10 }
 0x823   : > { %v1153_v60 = vpop.xlane.xlu0 %1152 }
 0x824   : > { %2956 = vrsqrt.f32 %v1158_v5  ;;  %v1156_v63 = vmul.f32 0.03125, %v1153_v60 }
 0x826   : > { %v1159_v2 = vadd.f32 1e-06, %v1156_v63 }
 0x828   : > { %2958 = vrsqrt.f32 %v1159_v2  ;;  %v2917_v2 = vld [vmem:[%s3932_s10 + $0x18] sm:$0xff]  }
 0x82c   : > { %v2955_v39 = vpop.eup %2954 }
 0x82d   : > { %v1163_v14 = vmul.f32 %v2955_v39, %v1139_v13  ;;  %v2914_v13 = vld [vmem:[%s3932_s10] sm:$0xff]   ;;  %v2919_v39 = vld [vmem:[%s3932_s10 + $0x28] sm:$0xff]  }
 0x82e   : > { %v2957_v43 = vpop.eup %2956  ;;  %2682 = vmatprep.subr.bf16.mxu0 %v2914_v13 }
 0x82f   : > { %v1164_v45 = vmul.f32 %v2957_v43, %v1140_v47  ;;  %v1170_v36 = vmul.f32 %v1169_v41, %v1163_v14  ;;  %v2915_v47 = vld [vmem:[%s3932_s10 + $0x8] sm:$0xff]   ;;  %v2920_v14 = vld [vmem:[%s3932_s10 + $0x30] sm:$0xff]   ;;  %v2921_v43 = vld [vmem:[%s3932_s10 + $0x38] sm:$0xff]  }
 0x831   : > { %v1171_v30 = vmul.f32 %v1169_v41, %v1164_v45  ;;  %v1177_v25 = vadd.f32 %v1176_v38, %v1170_v36  ;;  %v3938_v45 = vsub.s32 7, %v3311_v56 }
 0x832   : > { %v2959_v40 = vpop.eup %2958 }
 0x833   : > { %v1165_v12 = vmul.f32 %v2959_v40, %v1141_v4  ;;  %v1178_v52 = vadd.f32 %v1176_v38, %v1171_v30  ;;  %v2916_v4 = vld [vmem:[%s3932_s10 + $0x10] sm:$0xff]   ;;  %v1189_v36 = vrot.slane %v3319_v58, %v3938_v45 }
 0x835   : > { %v1184_v10 = vpack.c.bf16 %v1178_v52, %v1177_v25  ;;  %v1172_v5 = vmul.f32 %v1169_v41, %v1165_v12  ;;  %v2918_v41 = vld [vmem:[%s3932_s10 + $0x20] sm:$0xff]  }
 0x837   : > { %2678 = vmatprep.mubr.msk.bf16.mxu0 %vm502_vm2, %v1184_v10  ;;  %v1179_v60 = vadd.f32 %v1176_v38, %v1172_v5 }
 0x839   : > { %v1185_v63 = vpack.c.bf16 %v1179_v60, %v1179_v60 }
 0x83b   : > { %2679 = vmatmul.mubr.msk.bf16.vlgmr.msra.gmra.mrb[16].mxu0 %vm502_vm2, %v1185_v63 }
 0x83c   : > { %2683 = vmatpush3.bf16.msra.mxu0 %v2914_v13 }
 0x83d   : > { %2684 = vmatprep.subr.bf16.mxu0 %v2915_v47 }
 0x840   : > { %2685 = vmatpush3.bf16.msra.mxu0 %v2915_v47 }
 0x841   : > { %2686 = vmatprep.subr.bf16.mxu0 %v2916_v4 }
 0x844   : > { %2687 = vmatpush3.bf16.msra.mxu0 %v2916_v4 }
 0x845   : > { %2688 = vmatprep.subr.bf16.mxu0 %v2917_v2 }
 0x848   : > { %2689 = vmatpush3.bf16.msra.mxu0 %v2917_v2 }
 0x849   : > { %2690 = vmatprep.subr.bf16.mxu0 %v2918_v41 }
 0x84c   : > { %2691 = vmatpush3.bf16.msra.mxu0 %v2918_v41 }
 0x84d   : > { %2692 = vmatprep.subr.bf16.mxu0 %v2919_v39 }
 0x850   : > { %2693 = vmatpush3.bf16.msra.mxu0 %v2919_v39 }
 0x851   : > { %2694 = vmatprep.subr.bf16.mxu0 %v2920_v14 }
 0x854   : > { %2695 = vmatpush3.bf16.msra.mxu0 %v2920_v14 }
 0x855   : > { %2696 = vmatprep.subr.bf16.mxu0 %v2921_v43 }
 0x858   : > { %2697 = vmatpush3.bf16.msra.mxu0 %v2921_v43 }
 0x859   : > { %2829 = vmatprep.subr.bf16.mxu0 %v3069_v8 }
 0x90e   : > { %v2680_v38 = vpop.f32.mrb[16].mxu0 }
 0x90f   : > { %v1251_v30 = vadd.f32 %v2680_v38, %v1189_v36  ;;  %v1242_v40 = vpop.f32.mrb[17].mxu0 }
 0x910   : > { %v1243_v12 = vadd.f32 %v1242_v40, %v1189_v36  ;;  %v2681_v25 = vpop.f32.mrb[18].mxu0 }
 0x911   : > { %v1258_v52 = vmul.f32 %v1251_v30, %v1251_v30  ;;  %v1245_v10 = vpop.f32.mrb[19].mxu0 }
 0x912   : > { %v1256_v5 = vmul.f32 %v1243_v12, %v1243_v12  ;;  %v1246_v60 = vadd.f32 %v1245_v10, %v1189_v36 }
 0x913   : > { %v1261_v63 = vmul.f32 %v1258_v52, %v1251_v30 }
 0x914   : > { %v1259_v13 = vmul.f32 %v1256_v5, %v1243_v12  ;;  %v1257_v47 = vmul.f32 %v1246_v60, %v1246_v60 }
 0x915   : > { %v1264_v4 = vmul.f32 0.044715, %v1261_v63 }
 0x916   : > { %v1262_v2 = vmul.f32 0.044715, %v1259_v13  ;;  %v1260_v41 = vmul.f32 %v1257_v47, %v1246_v60 }
 0x917   : > { %v1267_v39 = vadd.f32 %v1264_v4, %v1251_v30 }
 0x918   : > { %v1265_v14 = vadd.f32 %v1262_v2, %v1243_v12  ;;  %v1263_v43 = vmul.f32 0.044715, %v1260_v41 }
 0x919   : > { %v1270_v37 = vmul.f32 0.7978846, %v1267_v39 }
 0x91a   : > { %v1268_v45 = vmul.f32 0.7978846, %v1265_v14  ;;  %v1266_v27 = vadd.f32 %v1263_v43, %v1246_v60 }
 0x91b   : > { %2960 = vtanh.f32 %v1270_v37 }
 0x91c   : > { %2962 = vtanh.f32 %v1268_v45  ;;  %v1269_v38 = vmul.f32 0.7978846, %v1266_v27 }
 0x91e   : > { %2964 = vtanh.f32 %v1269_v38 }
 0x925   : > { %v2961_v40 = vpop.eup %2960 }
 0x926   : > { %v2963_v25 = vpop.eup %2962  ;;  %v1276_v44 = vadd.f32 1.0, %v2961_v40 }
 0x927   : > { %v1274_v36 = vadd.f32 1.0, %v2963_v25 }
 0x928   : > { %v2965_v52 = vpop.eup %2964  ;;  %v1279_v10 = vmul.f32 0.5, %v1276_v44 }
 0x929   : > { %v1275_v5 = vadd.f32 1.0, %v2965_v52  ;;  %v1277_v63 = vmul.f32 0.5, %v1274_v36 }
 0x92a   : > { %v1282_v47 = vmul.f32 %v1279_v10, %v1251_v30 }
 0x92b   : > { %v1278_v13 = vmul.f32 0.5, %v1275_v5  ;;  %v1280_v4 = vmul.f32 %v1277_v63, %v1243_v12 }
 0x92c   : > { %v1300_v39 = vpack.c.bf16 %v1282_v47, %v1282_v47 }
 0x92d   : > { %v1281_v2 = vmul.f32 %v1278_v13, %v1246_v60 }
 0x92f   : > { %v1299_v41 = vpack.c.bf16 %v1281_v2, %v1280_v4  ;;  %v2922_v4 = vld [vmem:[%s3929_s7 + $0x10] sm:$0xff]   ;;  %v2923_v2 = vld [vmem:[%s3929_s7 + $0x18] sm:$0xff]  }
 0x930   : > { %2702 = vmatprep.subr.bf16.mxu1 %v2922_v4 }
 0x931   : > { %2698 = vmatprep.mubr.bf16.mxu0 %v1299_v41  ;;  %2703 = vmatpush3.bf16.msra.mxu1 %v2922_v4 }
 0x932   : > { %2699 = vmatmul.mubr.bf16.vlgmr.msra.gmra.mrb[20].mxu0 %v1300_v39  ;;  %2704 = vmatprep.subr.bf16.mxu1 %v2923_v2 }
 0x933   : > { %2831 = vmatpush3.bf16.msra.mxu0 %v3461_v7  ;;  %2750 = vmatprep.mubr.msk.f32.mxu0 %vm3065_vm0, %v3064_v1  ;;  %v1303_v7 = vsub.s32 5, %v3311_v56 }
 0x934   : > { %2832 = vmatprep.subr.bf16.mxu0 %v3069_v8 }
 0x935   : > { %2705 = vmatpush3.bf16.msra.mxu1 %v2923_v2 }
 0x937   : > { %2834 = vmatpush3.bf16.msra.mxu0 %v3467_v9  ;;  %v1304_v9 = vrot.slane %v3319_v58, %v1303_v7 }
 0x938   : > { %2835 = vmatprep.subr.bf16.mxu0 %v3069_v8 }
 0x93b   : > { %2837 = vmatpush3.bf16.msra.mxu0 %v3473_v11 }
 0x93c   : > { %2838 = vmatprep.subr.bf16.mxu0 %v3069_v8 }
 0x93f   : > { %2840 = vmatpush3.bf16.msra.mxu0 %v3479_v34 }
 0x940   : > { %2841 = vmatprep.subr.bf16.mxu0 %v3069_v8 }
 0x943   : > { %2843 = vmatpush3.bf16.msra.mxu0 %v3509_v55 }
 0x944   : > { %2844 = vmatprep.subr.bf16.mxu0 %v3069_v8 }
 0x947   : > { %2846 = vmatpush3.bf16.msra.mxu0 %v3518_v0 }
 0xa05   : > { %v2700_v11 = vpop.f32.mrb[20].mxu0 }
 0xa06   : > { %v1396_v34 = vadd.f32 %v2700_v11, %v1304_v9  ;;  %v1387_v8 = vpop.f32.mrb[21].mxu0 }
 0xa07   : > { %v1388_v55 = vadd.f32 %v1387_v8, %v1304_v9  ;;  %v2701_v0 = vpop.f32.mrb[22].mxu0 }
 0xa08   : > { %1403 = vst.msk [vmem:[%s3646_s18 + $0x10] sm:$0xff] %vm502_vm2, %v1396_v34  ;;  %v1390_v44 = vpop.f32.mrb[23].mxu0  ;;  %v3656_v37 = vadd.f32 %v1396_v34, %v3568_v51 }
 0xa09   : > { %1401 = vst.msk [vmem:[%s3646_s18] sm:$0xff] %vm502_vm2, %v1388_v55  ;;  %v3653_v58 = vadd.f32 %v1388_v55, %v3561_v42  ;;  %v1391_v27 = vadd.f32 %v1390_v44, %v1304_v9 }
 0xa0a   : > { %v1415_v42 = vsel %vm502_vm2, %v3656_v37, 0.0 }
 0xa0b   : > { %1402 = vst.msk [vmem:[%s3646_s18 + $0x8] sm:$0xff] %vm502_vm2, %v1391_v27  ;;  %v3661_v45 = vadd.f32 %v1391_v27, %v3564_v15  ;;  %v1409_v30 = vsel %vm502_vm2, %v3653_v58, 0.0  ;;  %v3684_v27 = vld [vmem:[%s3928_s6 + $0x8] sm:$0xff] }
 0xa0c   : > { %1410 = vadd.xlane.f32.xlu1 %v1409_v30  ;;  %v1451_v30 = vrot.slane %v3684_v27, %v3314_v57 }
 0xa0d   : > { %v1412_v12 = vsel %vm502_vm2, %v3661_v45, 0.0 }
 0xa0e   : > { %1413 = vadd.xlane.f32.xlu0 %v1412_v12 }
 0xa10   : > { %1416 = vadd.xlane.f32.xlu1 %v1415_v42 }
 0xa99   : > { %v1411_v60 = vpop.xlane.xlu1 %1410 }
 0xa9a   : > { %v1418_v51 = vmul.f32 0.03125, %v1411_v60 }
 0xa9b   : > { %v1414_v14 = vpop.xlane.xlu0 %1413 }
 0xa9c   : > { %v1421_v43 = vsub.f32 %v3653_v58, %v1418_v51  ;;  %v1419_v38 = vmul.f32 0.03125, %v1414_v14 }
 0xa9d   : > { %v1417_v15 = vpop.xlane.xlu1 %1416 }
 0xa9e   : > { %v1422_v40 = vsub.f32 %v3661_v45, %v1419_v38  ;;  %v1420_v25 = vmul.f32 0.03125, %v1417_v15  ;;  %v1424_v36 = vmul.f32 %v1421_v43, %v1421_v43  ;;  %v1458_v38 = vrot.slane %v3684_v27, %v3324_v62 }
 0xaa0   : > { %v1423_v52 = vsub.f32 %v3656_v37, %v1420_v25  ;;  %v1427_v10 = vsel %vm502_vm2, %v1424_v36, 0.0  ;;  %v1425_v5 = vmul.f32 %v1422_v40, %v1422_v40 }
 0xaa1   : > { %1428 = vadd.xlane.f32.xlu0 %v1427_v10 }
 0xaa2   : > { %v1430_v63 = vsel %vm502_vm2, %v1425_v5, 0.0  ;;  %v1426_v13 = vmul.f32 %v1423_v52, %v1423_v52 }
 0xaa3   : > { %1431 = vadd.xlane.f32.xlu1 %v1430_v63 }
 0xaa4   : > { %v1433_v47 = vsel %vm502_vm2, %v1426_v13, 0.0 }
 0xaa5   : > { %1434 = vadd.xlane.f32.xlu0 %v1433_v47 }
 0xb2e   : > { %v1429_v41 = vpop.xlane.xlu0 %1428 }
 0xb2f   : > { %v1436_v39 = vmul.f32 0.03125, %v1429_v41 }
 0xb30   : > { %v1432_v9 = vpop.xlane.xlu1 %1431 }
 0xb31   : > { %v1439_v11 = vadd.f32 1e-06, %v1436_v39  ;;  %v1437_v34 = vmul.f32 0.03125, %v1432_v9 }
 0xb32   : > { %v1435_v8 = vpop.xlane.xlu0 %1434 }
 0xb33   : > { %2966 = vrsqrt.f32 %v1439_v11  ;;  %v1440_v55 = vadd.f32 1e-06, %v1437_v34  ;;  %v1438_v0 = vmul.f32 0.03125, %v1435_v8 }
 0xb35   : > { %2968 = vrsqrt.f32 %v1440_v55  ;;  %v1441_v44 = vadd.f32 1e-06, %v1438_v0 }
 0xb37   : > { %2970 = vrsqrt.f32 %v1441_v44 }
 0xb3d   : > { %v2967_v12 = vpop.eup %2966 }
 0xb3e   : > { %v1445_v42 = vmul.f32 %v2967_v12, %v1421_v43  ;;  %v1472_v43 = vrot.slane %v3684_v27, %v565_v22 }
 0xb3f   : > { %v2969_v60 = vpop.eup %2968 }
 0xb40   : > { %v1446_v51 = vmul.f32 %v2969_v60, %v1422_v40  ;;  %v1452_v14 = vmul.f32 %v1451_v30, %v1445_v42 }
 0xb41   : > { %v2971_v15 = vpop.eup %2970 }
 0xb42   : > { %v1447_v25 = vmul.f32 %v2971_v15, %v1423_v52  ;;  %v1453_v36 = vmul.f32 %v1451_v30, %v1446_v51  ;;  %v1459_v10 = vadd.f32 %v1458_v38, %v1452_v14 }
 0xb44   : > { %v1460_v5 = vadd.f32 %v1458_v38, %v1453_v36  ;;  %v1454_v63 = vmul.f32 %v1451_v30, %v1447_v25 }
 0xb46   : > { %v1467_v13 = vpack.c.bf16 %v1460_v5, %v1459_v10  ;;  %v1461_v47 = vadd.f32 %v1458_v38, %v1454_v63 }
 0xb48   : > { %2706 = vmatprep.mubr.msk.bf16.mxu1 %vm502_vm2, %v1467_v13  ;;  %v1468_v4 = vpack.c.bf16 %v1461_v47, %v1461_v47 }
 0xb4a   : > { %2707 = vmatmul.mubr.msk.bf16.vlgmr.msra.gmra.mrb[12].mxu1 %vm502_vm2, %v1468_v4 }
 0xc1d   : > { %v2708_v40 = vpop.f32.mrb[12].mxu1 }
 0xc1e   : > { %v3695_v2 = vadd.f32 %v2708_v40, %v1472_v43  ;;  %v1525_v41 = vpop.f32.mrb[13].mxu1 }
 0xc1f   : > { %v1526_v52 = vadd.f32 %v1525_v41, %v1472_v43  ;;  %v2709_v39 = vpop.f32.mrb[14].mxu1 }
 0xc20   : > { %v1528_v9 = vpop.f32.mrb[15].mxu1  ;;  %v1541_v11 = vmul.f32 %v3695_v2, %v3333_v17  ;;  %v1550_v34 = vmul.f32 %v3695_v2, %v3381_v61  ;;  %v1547_v8 = vmul.f32 %v3695_v2, %v3353_v28  ;;  %v1544_v44 = vmul.f32 %v3695_v2, %v3341_v21 }
 0xc21   : > { %v1529_v55 = vadd.f32 %v1528_v9, %v1472_v43  ;;  %v1542_v0 = vmul.f32 %v1526_v52, %v3337_v19  ;;  %v1539_v22 = vmul.f32 %v1526_v52, %v3335_v18  ;;  %v1545_v30 = vmul.f32 %v1526_v52, %v3344_v23 }
 0xc22   : > { %v1548_v12 = vmul.f32 %v1526_v52, %v3357_v32  ;;  %v3711_v17 = vmul.f32 %v3695_v2, %v3433_v49  ;;  %v3714_v61 = vmul.f32 %v1526_v52, %v3431_v48  ;;  %v1557_v38 = vmul.f32 %v1526_v52, %v3495_v26 }
 0xc23   : > { %v1563_v28 = vpack.c.bf16 %v1529_v55, %v1526_v52  ;;  %v1566_v42 = vpack.c.bf16 %v1542_v0, %v1541_v11  ;;  %v1540_v19 = vmul.f32 %v1529_v55, %v3331_v16  ;;  %v1549_v18 = vmul.f32 %v1529_v55, %v3371_v53 }
 0xc24   : > { %v1543_v60 = vmul.f32 %v1529_v55, %v3339_v20  ;;  %v1546_v21 = vmul.f32 %v1529_v55, %v3346_v24  ;;  %v1569_v23 = vpack.c.bf16 %v1548_v12, %v1547_v8  ;;  %v1771_v32 = vpack.c.bf16 %v3714_v61, %v3711_v17 }
 0xc25   : > { %2722 = vmatprep.mubr.msk.bf16.mxu1 %vm502_vm2, %v1563_v28  ;;  %1579 = vrot.lane.b32.xlu0 %v1566_v42, %s3067_s16  ;;  %v1565_v48 = vpack.c.bf16 %v1540_v19, %v1539_v22  ;;  %v1570_v49 = vpack.c.bf16 %v1550_v34, %v1549_v18  ;;  %v1555_v51 = vmul.f32 %v1529_v55, %v3443_v59 }
 0xc26   : > { %v1567_v14 = vpack.c.bf16 %v1544_v44, %v1543_v60  ;;  %v1568_v16 = vpack.c.bf16 %v1546_v21, %v1545_v30  ;;  %v1556_v53 = vmul.f32 %v3695_v2, %v3440_v54  ;;  %v1551_v20 = vmul.f32 %v1526_v52, %v3429_v46 }
 0xc27   : > { %1577 = vrot.lane.b32.xlu1 %v1565_v48, %s3067_s16  ;;  %v1552_v24 = vmul.f32 %v1529_v55, %v3426_v33  ;;  %v1558_v15 = vmul.f32 %v1529_v55, %v3497_v29  ;;  %v1559_v25 = vmul.f32 %v3695_v2, %v3499_v31  ;;  %v1560_v59 = vmul.f32 %v1526_v52, %v3501_v50 }
 0xc28   : > { %v1772_v36 = vpack.c.bf16 %v1556_v53, %v1555_v51  ;;  %v1561_v10 = vmul.f32 %v1529_v55, %v3525_v3  ;;  %v1562_v54 = vmul.f32 %v3695_v2, %v3530_v6  ;;  %v1564_v52 = vpack.c.bf16 %v3695_v2, %v3695_v2 }
 0xc29   : > { %1587 = vrot.lane.b32.xlu0 %v1570_v49, %s3067_s16  ;;  %v1770_v46 = vpack.c.bf16 %v1552_v24, %v1551_v20  ;;  %v1773_v5 = vpack.c.bf16 %v1558_v15, %v1557_v38  ;;  %v1774_v33 = vpack.c.bf16 %v1560_v59, %v1559_v25  ;;  %v2925_v24 = vld [vmem:[%s3930_s8 + $0x18] sm:$0xff]  }
 0xc2a   : > { %v1775_v63 = vpack.c.bf16 %v1562_v54, %v1561_v10 }
 0xc2b   : > { %1581 = vrot.lane.b32.xlu1 %v1567_v14, %s3067_s16 }
 0xc2f   : > { %1583 = vrot.lane.b32.xlu1 %v1568_v16, %s3067_s16 }
 0xc33   : > { %1585 = vrot.lane.b32.xlu1 %v1569_v23, %s3067_s16  ;;  %s3945_s16 = smov 64  }
 0xc97   : > { %v1580_v31 = vpop.permute.xlu0 %1579 }
 0xc98   : > { %v1599_v50 = vsel %vm502_vm2, %v1580_v31, 0 }
 0xc99   : > { %v1578_v26 = vpop.permute.xlu1 %1577 }
 0xc9a   : > { %v1596_v29 = vsel %vm502_vm2, %v1578_v26, 0  ;;  %2853 = vmatprep.subr.msk.bf16.mxu1 %vm502_vm2, %v1578_v26 }
 0xc9b   : > { %2711 = vmatpush3.bf16.xpose.msra.mxu1 %v1596_v29  ;;  %v1588_v40 = vpop.permute.xlu0 %1587 }
 0xc9c   : > { %2854 = vmatprep.subr.msk.bf16.mxu1 %vm502_vm2, %v1580_v31  ;;  %v1611_v41 = vsel %vm502_vm2, %v1588_v40, 0 }
 0xc9d   : > { %v1582_v3 = vpop.permute.xlu1 %1581 }
 0xc9e   : > { %v1602_v6 = vsel %vm502_vm2, %v1582_v3, 0 }
 0xca1   : > { %v1584_v13 = vpop.permute.xlu1 %1583 }
 0xca2   : > { %v1605_v47 = vsel %vm502_vm2, %v1584_v13, 0 }
 0xca3   : > { %2713 = vmatpush3.bf16.xpose.msra.mxu1 %v1599_v50 }
 0xca4   : > { %2855 = vmatprep.subr.msk.bf16.mxu1 %vm502_vm2, %v1582_v3 }
 0xca5   : > { %v1586_v4 = vpop.permute.xlu1 %1585 }
 0xca6   : > { %v1608_v43 = vsel %vm502_vm2, %v1586_v4, 0 }
 0xcab   : > { %2715 = vmatpush3.bf16.xpose.msra.mxu1 %v1602_v6 }
 0xcac   : > { %2856 = vmatprep.subr.msk.bf16.mxu1 %vm502_vm2, %v1584_v13 }
 0xcb3   : > { %2717 = vmatpush3.bf16.xpose.msra.mxu1 %v1605_v47 }
 0xcb4   : > { %2857 = vmatprep.subr.msk.bf16.mxu1 %vm502_vm2, %v1586_v4  ;;  %v3946_v4 = vsub.s32 4, %v3311_v56 }
 0xcbb   : > { %2719 = vmatpush3.bf16.xpose.msra.mxu1 %v1608_v43  ;;  %v1939_v43 = vrot.slane %v3684_v27, %v3946_v4  ;;  %v2929_v4 = vld [vmem:[%s3932_s10 + $0x48] sm:$0xff]  }
 0xcbc   : > { %2858 = vmatprep.subr.msk.bf16.mxu1 %vm502_vm2, %v1588_v40 }
 0xcc3   : > { %2721 = vmatpush3.bf16.xpose.msra.mxu1 %v1611_v41 }
 0xcca   : > { %2723 = vmatmul.mubr.msk.bf16.vlgmr.msra.gmra.mrb[16].mxu1 %vm502_vm2, %v1564_v52 }
 0xd9d   : > { %v2724_v39 = vpop.f32.mrb[16].mxu1 }
 0xd9e   : > { %v1656_v9 = vadd.f32 %v2724_v39, %v3487_v35  ;;  %v1647_v11 = vpop.f32.mrb[17].mxu1 }
 0xd9f   : > { %v1648_v34 = vadd.f32 %v3487_v35, %v1647_v11  ;;  %v2725_v8 = vpop.f32.mrb[18].mxu1 }
 0xda0   : > { %v1650_v55 = vpop.f32.mrb[19].mxu1  ;;  %v1667_v0 = vsel %vm845_vm3, %v1656_v9, -inf }
 0xda1   : > { %v1651_v22 = vadd.f32 %v3487_v35, %v1650_v55  ;;  %1668 = vmax.xlane.f32.xlu0 %v1667_v0  ;;  %v1661_v44 = vsel %vm845_vm3, %v1648_v34, -inf }
 0xda2   : > { %1662 = vmax.xlane.f32.xlu1 %v1661_v44 }
 0xda3   : > { %v1664_v2 = vsel %vm845_vm3, %v1651_v22, -inf }
 0xda5   : > { %1665 = vmax.xlane.f32.xlu0 %v1664_v2 }
 0xdb3   : > { %1784 = vrot.lane.b32.xlu1 %v1771_v32, %s3945_s16 }
 0xdb7   : > { %1786 = vrot.lane.b32.xlu1 %v1772_v36, %s3945_s16 }
 0xdbb   : > { %1782 = vrot.lane.b32.xlu0 %v1770_v46, %s3945_s16  ;;  %1788 = vrot.lane.b32.xlu1 %v1773_v5, %s3945_s16 }
 0xdbf   : > { %1790 = vrot.lane.b32.xlu0 %v1774_v33, %s3945_s16  ;;  %1792 = vrot.lane.b32.xlu1 %v1775_v63, %s3945_s16 }
 0xe2e   : > { %v1669_v35 = vpop.xlane.xlu0 %1668 }
 0xe2f   : > { %v1663_v30 = vpop.xlane.xlu1 %1662  ;;  %v1672_v18 = vsub.f32 %v1656_v9, %v1669_v35 }
 0xe30   : > { %v1670_v12 = vsub.f32 %v1648_v34, %v1663_v30 }
 0xe31   : > { %v1677_v60 = vmul.f32 1.442695, %v1672_v18 }
 0xe32   : > { %v1673_v28 = vmul.f32 1.442695, %v1670_v12  ;;  %v1666_v42 = vpop.xlane.xlu0 %1665 }
 0xe33   : > { %v1671_v19 = vsub.f32 %v1651_v22, %v1666_v42  ;;  %v1785_v21 = vpop.permute.xlu1 %1784 }
 0xe34   : > { %2972 = vpow2.f32 %v1673_v28 }
 0xe35   : > { %v1675_v17 = vmul.f32 1.442695, %v1671_v19 }
 0xe36   : > { %v1783_v61 = vpop.permute.xlu0 %1782 }
 0xe37   : > { %2974 = vpow2.f32 %v1675_v17  ;;  %2759 = vmatprep.subr.bf16.mxu0 %v1783_v61  ;;  %v1787_v48 = vpop.permute.xlu1 %1786 }
 0xe38   : > { %2976 = vpow2.f32 %v1677_v60 }
 0xe3a   : > { %v1791_v16 = vpop.permute.xlu0 %1790 }
 0xe3b   : > { %v1789_v14 = vpop.permute.xlu1 %1788 }
 0xe3e   : > { %v2973_v23 = vpop.eup %2972 }
 0xe3f   : > { %2751 = vmatmul.mubr.msk.f32.vlgmr.msra.gmra.mrb[24].mxu0 %vm845_vm3, %v2973_v23  ;;  %v1793_v53 = vpop.permute.xlu1 %1792 }
 0xe40   : > { %2760 = vmatpush3.bf16.msra.mxu0 %v1783_v61  ;;  %2753 = vmatprep.mubr.msk.f32.mxu0 %vm3065_vm0, %v3064_v1 }
 0xe41   : > { %v2975_v32 = vpop.eup %2974  ;;  %2761 = vmatprep.subr.bf16.mxu0 %v1785_v21 }
 0xe42   : > { %v2977_v49 = vpop.eup %2976  ;;  %v1768_v51 = vpack.c.bf16 %v2975_v32, %v2973_v23  ;;  %v2926_v23 = vld [vmem:[%s3931_s9 + $0x10] sm:$0xff]  }
 0xe43   : > { %2754 = vmatmul.mubr.msk.f32.gmra.mrb[26].mxu0 %vm845_vm3, %v2975_v32  ;;  %v1769_v20 = vpack.c.bf16 %v2977_v49, %v2977_v49  ;;  %v2927_v32 = vld [vmem:[%s3931_s9 + $0x18] sm:$0xff]  }
 0xe44   : > { %2762 = vmatpush3.bf16.msra.mxu0 %v1785_v21  ;;  %2756 = vmatprep.mubr.msk.f32.mxu0 %vm3065_vm0, %v3064_v1  ;;  %v2924_v1 = vld [vmem:[%s3930_s8 + $0x10] sm:$0xff]  }
 0xe45   : > { %2763 = vmatprep.subr.bf16.mxu0 %v1787_v48  ;;  %2775 = vmatprep.subr.bf16.mxu1 %v2924_v1 }
 0xe46   : > { %2776 = vmatpush3.bf16.msra.mxu1 %v2924_v1 }
 0xe47   : > { %2757 = vmatmul.mubr.msk.f32.gmra.mrb[28].mxu0 %vm845_vm3, %v2977_v49  ;;  %2777 = vmatprep.subr.bf16.mxu1 %v2925_v24 }
 0xe48   : > { %2764 = vmatpush3.bf16.msra.mxu0 %v1787_v48  ;;  %2771 = vmatprep.mubr.msk.bf16.mxu0 %vm845_vm3, %v1768_v51 }
 0xe49   : > { %2765 = vmatprep.subr.bf16.mxu0 %v1789_v14 }
 0xe4a   : > { %2778 = vmatpush3.bf16.msra.mxu1 %v2925_v24 }
 0xe4b   : > { %2783 = vmatprep.subr.bf16.mxu1 %v2926_v23 }
 0xe4c   : > { %2766 = vmatpush3.bf16.msra.mxu0 %v1789_v14 }
 0xe4d   : > { %2767 = vmatprep.subr.bf16.mxu0 %v1791_v16 }
 0xe50   : > { %2768 = vmatpush3.bf16.msra.mxu0 %v1791_v16 }
 0xe51   : > { %2769 = vmatprep.subr.bf16.mxu0 %v1793_v53 }
 0xe54   : > { %2770 = vmatpush3.bf16.msra.mxu0 %v1793_v53 }
 0xe57   : > { %2772 = vmatmul.mubr.msk.bf16.vlgmr.msra.gmra.mrb[32].mxu0 %vm845_vm3, %v1769_v20 }
 0xf12   : > { %v1754_v38 = vpop.f32.mrb[24].mxu0 }
 0xf13   : > { %v2752_v15 = vpop.f32.mrb[25].mxu0 }
 0xf16   : > { %v1759_v25 = vpop.f32.mrb[26].mxu0 }
 0xf17   : > { %v2755_v36 = vpop.f32.mrb[27].mxu0 }
 0xf1a   : > { %v1764_v59 = vpop.f32.mrb[28].mxu0 }
 0xf1b   : > { %v2758_v10 = vpop.f32.mrb[29].mxu0  ;;  %2978 = vrcp.f32 %v1764_v59 }
 0xf1c   : > { %2980 = vrcp.f32 %v1754_v38 }
 0xf1d   : > { %2982 = vrcp.f32 %v1759_v25  ;;  %v3947_v25 = vsub.s32 2, %v3311_v56 }
 0xf1f   : > { %v1985_v36 = vrot.slane %v3684_v27, %v3947_v25 }
 0xf25   : > { %v2979_v54 = vpop.eup %2978 }
 0xf26   : > { %v2981_v5 = vpop.eup %2980 }
 0xf27   : > { %v2983_v31 = vpop.eup %2982 }
 0xf2a   : > { %v2773_v46 = vpop.f32.mrb[32].mxu0 }
 0xf2b   : > { %v1859_v33 = vmul.f32 %v2979_v54, %v2773_v46  ;;  %v1840_v63 = vpop.f32.mrb[33].mxu0 }
 0xf2c   : > { %v1857_v26 = vmul.f32 %v2981_v5, %v1840_v63  ;;  %v2774_v29 = vpop.f32.mrb[34].mxu0  ;;  %v3948_v5 = vsub.s32 3, %v3311_v56 }
 0xf2d   : > { %v1843_v50 = vpop.f32.mrb[35].mxu0  ;;  %v1866_v13 = vpack.c.bf16 %v1859_v33, %v1859_v33 }
 0xf2e   : > { %v1858_v3 = vmul.f32 %v2983_v31, %v1843_v50  ;;  %v1992_v33 = vrot.slane %v3684_v27, %v3948_v5 }
 0xf30   : > { %v1865_v6 = vpack.c.bf16 %v1858_v3, %v1857_v26 }
 0xf32   : > { %2779 = vmatprep.mubr.msk.bf16.mxu1 %vm502_vm2, %v1865_v6 }
 0xf33   : > { %2780 = vmatmul.mubr.msk.bf16.vlgmr.msra.gmra.mrb[20].mxu1 %vm502_vm2, %v1866_v13 }
 0xf34   : > { %2784 = vmatpush3.bf16.msra.mxu1 %v2926_v23 }
 0xf35   : > { %2785 = vmatprep.subr.bf16.mxu1 %v2927_v32 }
 0xf38   : > { %2786 = vmatpush3.bf16.msra.mxu1 %v2927_v32 }
0x1006   : > { %v2781_v47 = vpop.f32.mrb[20].mxu1 }
0x1007   : > { %v1919_v40 = vpop.f32.mrb[21].mxu1  ;;  %v1935_v41 = vadd.f32 %v2781_v47, %v3656_v37  ;;  %v2928_v47 = vld [vmem:[%s3932_s10 + $0x40] sm:$0xff]  }
0x1008   : > { %v1933_v52 = vadd.f32 %v1919_v40, %v3653_v58  ;;  %v2782_v39 = vpop.f32.mrb[22].mxu1  ;;  %2791 = vmatprep.subr.bf16.mxu1 %v2928_v47  ;;  %v2931_v40 = vld [vmem:[%s3932_s10 + $0x58] sm:$0xff]  }
0x1009   : > { %v1922_v9 = vpop.f32.mrb[23].mxu1  ;;  %v1942_v0 = vadd.f32 %v1939_v43, %v1935_v41  ;;  %v2932_v41 = vld [vmem:[%s3932_s10 + $0x60] sm:$0xff]   ;;  %v2934_v39 = vld [vmem:[%s3932_s10 + $0x70] sm:$0xff]  }
0x100a   : > { %v3794_v11 = vadd.f32 %v1939_v43, %v1933_v52  ;;  %v1934_v34 = vadd.f32 %v1922_v9, %v3661_v45  ;;  %v2933_v52 = vld [vmem:[%s3932_s10 + $0x68] sm:$0xff]   ;;  %v2935_v9 = vld [vmem:[%s3932_s10 + $0x78] sm:$0xff]  }
0x100b   : > { %v1949_v37 = vsel %vm502_vm2, %v1942_v0, 0.0 }
0x100c   : > { %v3797_v8 = vadd.f32 %v1939_v43, %v1934_v34  ;;  %v1943_v55 = vsel %vm502_vm2, %v3794_v11, 0.0  ;;  %v2930_v43 = vld [vmem:[%s3932_s10 + $0x50] sm:$0xff]   ;;  %v3949_v34 = vsub.s32 7, %v3311_v56 }
0x100d   : > { %1944 = vadd.xlane.f32.xlu0 %v1943_v55 }
0x100e   : > { %v1946_v22 = vsel %vm502_vm2, %v3797_v8, 0.0  ;;  %v2006_v55 = vrot.slane %v3684_v27, %v3949_v34 }
0x100f   : > { %1947 = vadd.xlane.f32.xlu1 %v1946_v22 }
0x1011   : > { %1950 = vadd.xlane.f32.xlu0 %v1949_v37 }
0x109a   : > { %v1945_v58 = vpop.xlane.xlu0 %1944 }
0x109b   : > { %v1952_v44 = vmul.f32 0.03125, %v1945_v58 }
0x109c   : > { %v1948_v2 = vpop.xlane.xlu1 %1947 }
0x109d   : > { %v1955_v35 = vsub.f32 %v3794_v11, %v1952_v44  ;;  %v1953_v45 = vmul.f32 0.03125, %v1948_v2 }
0x109e   : > { %v1951_v30 = vpop.xlane.xlu0 %1950 }
0x109f   : > { %v1956_v12 = vsub.f32 %v3797_v8, %v1953_v45  ;;  %v1954_v28 = vmul.f32 0.03125, %v1951_v30  ;;  %v1958_v42 = vmul.f32 %v1955_v35, %v1955_v35 }
0x10a1   : > { %v1957_v19 = vsub.f32 %v1942_v0, %v1954_v28  ;;  %v1961_v18 = vsel %vm502_vm2, %v1958_v42, 0.0  ;;  %v1959_v17 = vmul.f32 %v1956_v12, %v1956_v12 }
0x10a2   : > { %1962 = vadd.xlane.f32.xlu0 %v1961_v18 }
0x10a3   : > { %v1960_v61 = vmul.f32 %v1957_v19, %v1957_v19  ;;  %v1964_v21 = vsel %vm502_vm2, %v1959_v17, 0.0 }
0x10a5   : > { %v1967_v60 = vsel %vm502_vm2, %v1960_v61, 0.0 }
0x10a6   : > { %1968 = vadd.xlane.f32.xlu1 %v1967_v60  ;;  %1965 = vadd.xlane.f32.xlu0 %v1964_v21 }
0x112f   : > { %v1963_v48 = vpop.xlane.xlu0 %1962 }
0x1130   : > { %v1970_v49 = vmul.f32 0.03125, %v1963_v48 }
0x1132   : > { %v1973_v51 = vadd.f32 1e-06, %v1970_v49 }
0x1133   : > { %v1966_v14 = vpop.xlane.xlu0 %1965  ;;  %v1969_v16 = vpop.xlane.xlu1 %1968 }
0x1134   : > { %2984 = vrsqrt.f32 %v1973_v51  ;;  %v1971_v53 = vmul.f32 0.03125, %v1966_v14  ;;  %v1972_v20 = vmul.f32 0.03125, %v1969_v16 }
0x1136   : > { %v1974_v1 = vadd.f32 1e-06, %v1971_v53  ;;  %v1975_v24 = vadd.f32 1e-06, %v1972_v20 }
0x1138   : > { %2986 = vrsqrt.f32 %v1974_v1 }
0x1139   : > { %2988 = vrsqrt.f32 %v1975_v24 }
0x113e   : > { %v2985_v38 = vpop.eup %2984 }
0x113f   : > { %v1979_v15 = vmul.f32 %v2985_v38, %v1955_v35 }
0x1141   : > { %v1986_v46 = vmul.f32 %v1985_v36, %v1979_v15 }
0x1142   : > { %v2987_v59 = vpop.eup %2986 }
0x1143   : > { %v2989_v10 = vpop.eup %2988  ;;  %v1980_v54 = vmul.f32 %v2987_v59, %v1956_v12  ;;  %v1993_v31 = vadd.f32 %v1992_v33, %v1986_v46  ;;  %v2122_v46 = vrot.slane %v3684_v27, %v1303_v7 }
0x1144   : > { %v1981_v63 = vmul.f32 %v2989_v10, %v1957_v19 }
0x1145   : > { %v1987_v26 = vmul.f32 %v1985_v36, %v1980_v54 }
0x1146   : > { %v1988_v29 = vmul.f32 %v1985_v36, %v1981_v63 }
0x1147   : > { %v1994_v50 = vadd.f32 %v1992_v33, %v1987_v26 }
0x1148   : > { %v1995_v3 = vadd.f32 %v1992_v33, %v1988_v29 }
0x1149   : > { %v2001_v6 = vpack.c.bf16 %v1994_v50, %v1993_v31 }
0x114a   : > { %v2002_v13 = vpack.c.bf16 %v1995_v3, %v1995_v3 }
0x114b   : > { %2787 = vmatprep.mubr.msk.bf16.mxu1 %vm502_vm2, %v2001_v6 }
0x114c   : > { %2788 = vmatmul.mubr.msk.bf16.vlgmr.msra.gmra.mrb[24].mxu1 %vm502_vm2, %v2002_v13 }
0x114d   : > { %2792 = vmatpush3.bf16.msra.mxu1 %v2928_v47 }
0x114e   : > { %2793 = vmatprep.subr.bf16.mxu1 %v2929_v4 }
0x1151   : > { %2794 = vmatpush3.bf16.msra.mxu1 %v2929_v4 }
0x1152   : > { %2795 = vmatprep.subr.bf16.mxu1 %v2930_v43 }
0x1155   : > { %2796 = vmatpush3.bf16.msra.mxu1 %v2930_v43 }
0x1156   : > { %2797 = vmatprep.subr.bf16.mxu1 %v2931_v40 }
0x1159   : > { %2798 = vmatpush3.bf16.msra.mxu1 %v2931_v40 }
0x115a   : > { %2799 = vmatprep.subr.bf16.mxu1 %v2932_v41 }
0x115d   : > { %2800 = vmatpush3.bf16.msra.mxu1 %v2932_v41 }
0x115e   : > { %2801 = vmatprep.subr.bf16.mxu1 %v2933_v52 }
0x1161   : > { %2802 = vmatpush3.bf16.msra.mxu1 %v2933_v52 }
0x1162   : > { %2803 = vmatprep.subr.bf16.mxu1 %v2934_v39 }
0x1165   : > { %2804 = vmatpush3.bf16.msra.mxu1 %v2934_v39 }
0x1166   : > { %2805 = vmatprep.subr.bf16.mxu1 %v2935_v9 }
0x1169   : > { %2806 = vmatpush3.bf16.msra.mxu1 %v2935_v9 }
0x121f   : > { %v2789_v0 = vpop.f32.mrb[24].mxu1 }
0x1220   : > { %v2068_v22 = vadd.f32 %v2789_v0, %v2006_v55  ;;  %v2059_v37 = vpop.f32.mrb[25].mxu1 }
0x1221   : > { %v2060_v58 = vadd.f32 %v2059_v37, %v2006_v55  ;;  %v2790_v44 = vpop.f32.mrb[26].mxu1  ;;  %v2225_v37 = vld [vmem:[%s3927_s5] sm:$0x3] }
0x1222   : > { %v2075_v2 = vmul.f32 %v2068_v22, %v2068_v22  ;;  %v2062_v35 = vpop.f32.mrb[27].mxu1 }
0x1223   : > { %v2073_v45 = vmul.f32 %v2060_v58, %v2060_v58  ;;  %v2063_v30 = vadd.f32 %v2062_v35, %v2006_v55 }
0x1224   : > { %v2078_v12 = vmul.f32 %v2075_v2, %v2068_v22  ;;  %v2261_v2 = vrot.slane %v2225_v37, %v3324_v62 }
0x1225   : > { %v2076_v28 = vmul.f32 %v2073_v45, %v2060_v58  ;;  %v2074_v42 = vmul.f32 %v2063_v30, %v2063_v30 }
0x1226   : > { %v2081_v19 = vmul.f32 0.044715, %v2078_v12 }
0x1227   : > { %v2079_v18 = vmul.f32 0.044715, %v2076_v28  ;;  %v2077_v17 = vmul.f32 %v2074_v42, %v2063_v30 }
0x1228   : > { %v2084_v61 = vadd.f32 %v2081_v19, %v2068_v22 }
0x1229   : > { %v2082_v60 = vadd.f32 %v2079_v18, %v2060_v58  ;;  %v2080_v21 = vmul.f32 0.044715, %v2077_v17 }
0x122a   : > { %v2087_v23 = vmul.f32 0.7978846, %v2084_v61 }
0x122b   : > { %v2085_v32 = vmul.f32 0.7978846, %v2082_v60  ;;  %v2083_v48 = vadd.f32 %v2080_v21, %v2063_v30 }
0x122c   : > { %2990 = vtanh.f32 %v2087_v23 }
0x122d   : > { %2992 = vtanh.f32 %v2085_v32  ;;  %v2086_v49 = vmul.f32 0.7978846, %v2083_v48 }
0x122f   : > { %2994 = vtanh.f32 %v2086_v49 }
0x1236   : > { %v2991_v51 = vpop.eup %2990 }
0x1237   : > { %v2993_v14 = vpop.eup %2992  ;;  %v2093_v16 = vadd.f32 1.0, %v2991_v51 }
0x1238   : > { %v2091_v53 = vadd.f32 1.0, %v2993_v14 }
0x1239   : > { %v2995_v20 = vpop.eup %2994  ;;  %v2096_v1 = vmul.f32 0.5, %v2093_v16 }
0x123a   : > { %v2092_v24 = vadd.f32 1.0, %v2995_v20  ;;  %v2094_v38 = vmul.f32 0.5, %v2091_v53 }
0x123b   : > { %v2099_v25 = vmul.f32 %v2096_v1, %v2068_v22 }
0x123c   : > { %v2095_v15 = vmul.f32 0.5, %v2092_v24  ;;  %v2097_v36 = vmul.f32 %v2094_v38, %v2060_v58  ;;  %v2255_v58 = vrot.slane %v2225_v37, %v3314_v57 }
0x123d   : > { %v2118_v54 = vpack.c.bf16 %v2099_v25, %v2099_v25 }
0x123e   : > { %v2098_v59 = vmul.f32 %v2095_v15, %v2063_v30 }
0x1240   : > { %v2117_v10 = vpack.c.bf16 %v2098_v59, %v2097_v36 }
0x1242   : > { %2807 = vmatprep.mubr.bf16.mxu1 %v2117_v10 }
0x1243   : > { %2808 = vmatmul.mubr.bf16.vlgmr.msra.gmra.mrb[28].mxu1 %v2118_v54 }
0x1316   : > { %v2809_v5 = vpop.f32.mrb[28].mxu1 }
0x1317   : > { %v2214_v33 = vadd.f32 %v2809_v5, %v2122_v46  ;;  %v2205_v63 = vpop.f32.mrb[29].mxu1 }
0x1318   : > { %v2206_v26 = vadd.f32 %v2205_v63, %v2122_v46  ;;  %v2810_v29 = vpop.f32.mrb[30].mxu1 }
0x1319   : > { %2471 = vst.msk [vmem:[%s3646_s18 + $0x28] sm:$0xff] %vm502_vm2, %v2214_v33  ;;  %v2208_v31 = vpop.f32.mrb[31].mxu1 }
0x131a   : > { %2469 = vst.msk [vmem:[%s3646_s18 + $0x18] sm:$0xff] %vm502_vm2, %v2206_v26  ;;  %v2209_v50 = vadd.f32 %v2208_v31, %v2122_v46  ;;  %v2223_v3 = vadd.f32 %v2206_v26, %v3794_v11 }
0x131c   : > { %2470 = vst.msk [vmem:[%s3646_s18 + $0x20] sm:$0xff] %vm502_vm2, %v2209_v50  ;;  %v2226_v6 = vsel %vm502_vm2, %v2223_v3, 0.0  ;;  %v2224_v56 = vadd.f32 %v2209_v50, %v3797_v8  ;;  %s405_s18 = sand.u32 1, %s3054_s22  }
0x131d   : > { %2227 = vadd.xlane.f32.xlu0 %v2226_v6  ;;  %s2379_s16 = sshll.u32 %s405_s18, 4  ;;  %s3881_s25 = scalar_lea.sflag [#allocation3], %s405_s18 }
0x131e   : > { %v2229_v7 = vsel %vm502_vm2, %v2224_v56, 0.0  ;;  %s407_s15 = scalar_lea.vmem [#allocation2], %s2379_s16  ;;  %s3004_s16 = sshll.u32 %s3070_s28, 4  ;;  %s3005_s16 = int_to_ptr.vmem [resolvable:$false] %s3004_s16 }
0x131f   : > { %2230 = vadd.xlane.f32.xlu1 %v2229_v7  ;;  %s2285_s17 = sshll.u32 %s407_s15, 4  ;;  %s3006_s29 = scalar_lea.vmem %s3005_s16, 512  ;;  %s3877_s17 = int_to_ptr.vmem [resolvable:$true] %s2285_s17 }
0x1320   : > { %s3000_s26 = scalar_lea.vmem %s3877_s17, 256  ;;  %p3007_p0 = scmp.lt.s32.totalorder %s3877_s17, %s3005_s16 }
0x1321   : > { %p3001_p11 = scmp.ne.s32.totalorder %s3877_s17, %s3000_s26  ;;  %p3008_p1 = scmp.lt.s32.totalorder %s3006_s29, %s3000_s26 }
0x1323   : > { %p3002_p12 = pnand %p3001_p11, %p3176_p5  ;;  %p3009_p2 = por %p3008_p1, %p3007_p0 }
0x1325   : > { %p3003_p13 = pneg %p3002_p12 }
0x1327   : > { %p3010_p3 = pnand %p3009_p2, %p3003_p13 }
0x13aa   : > { %v2228_v27 = vpop.xlane.xlu0 %2227 }
0x13ab   : > { %v2232_v13 = vmul.f32 0.03125, %v2228_v27 }
0x13ac   : > { %v2231_v47 = vpop.xlane.xlu1 %2230 }
0x13ad   : > { %v2234_v4 = vsub.f32 %v2223_v3, %v2232_v13  ;;  %v2233_v43 = vmul.f32 0.03125, %v2231_v47 }
0x13af   : > { %v2235_v40 = vsub.f32 %v2224_v56, %v2233_v43  ;;  %v2236_v41 = vmul.f32 %v2234_v4, %v2234_v4 }
0x13b1   : > { %v2238_v11 = vsel %vm502_vm2, %v2236_v41, 0.0  ;;  %v2237_v52 = vmul.f32 %v2235_v40, %v2235_v40 }
0x13b2   : > { %2239 = vadd.xlane.f32.xlu0 %v2238_v11 }
0x13b3   : > { %v2241_v39 = vsel %vm502_vm2, %v2237_v52, 0.0 }
0x13b4   : > { %2242 = vadd.xlane.f32.xlu1 %v2241_v39 }
0x143f   : > { %v2240_v8 = vpop.xlane.xlu0 %2239 }
0x1440   : > { %v2244_v9 = vmul.f32 0.03125, %v2240_v8 }
0x1441   : > { %v2243_v34 = vpop.xlane.xlu1 %2242 }
0x1442   : > { %v2246_v55 = vadd.f32 1e-06, %v2244_v9  ;;  %v2245_v0 = vmul.f32 0.03125, %v2243_v34 }
0x1444   : > { %2996 = vrsqrt.f32 %v2246_v55  ;;  %v2247_v22 = vadd.f32 1e-06, %v2245_v0 }
0x1446   : > { %2998 = vrsqrt.f32 %v2247_v22 }
0x144e   : > { %v2997_v44 = vpop.eup %2996 }
0x144f   : > { %v2250_v35 = vmul.f32 %v2997_v44, %v2234_v4 }
0x1450   : > { %v2999_v45 = vpop.eup %2998 }
0x1451   : > { %v2256_v30 = vmul.f32 %v2255_v58, %v2250_v35  ;;  %v2251_v12 = vmul.f32 %v2999_v45, %v2235_v40 }
0x1453   : > { %v2262_v28 = vadd.f32 %v2261_v2, %v2256_v30  ;;  %v2257_v42 = vmul.f32 %v2255_v58, %v2251_v12 }
0x1455   : > { %v2263_v57 = vadd.f32 %v2261_v2, %v2257_v42  ;;  %2264 = vst.msk [vmem:[%s407_s15] sm:$0xff] %vm502_vm2, %v2262_v28 }
0x1457   : > { %2265 = vst.msk [vmem:[%s407_s15 + $0x8] sm:$0xff] %vm502_vm2, %v2263_v57 }
0x1458   : > { %3013 = shalt.err (!%p3010_p3)
}
0x1459   : > { %s3014_s18 = scalar_lea.hbm %s3875_s0, 256  ;;  %s3018_s20 = scalar_lea.hbm %s3933_s11, 512 }
0x145a   : > { %p3015_p4 = scmp.ne.s32.totalorder %s3875_s0, %s3014_s18  ;;  %p3019_p9 = scmp.lt.u32.totalorder %s3875_s0, %s3933_s11 }
0x145b   : > { %p3020_p10 = scmp.lt.u32.totalorder %s3018_s20, %s3014_s18  ;;  %p3022_p12 = scmp.lt.u32.totalorder %s3014_s18, %s3875_s0 }
0x145c   : > { %p3016_p7 = pnand %p3015_p4, %p3176_p5 }
0x145d   : > { %p3021_p11 = por %p3020_p10, %p3019_p9 }
0x145e   : > { %p3017_p8 = pneg %p3016_p7 }
0x145f   : > { %p3023_p13 = por %p3022_p12, %p3021_p11 }
0x1461   : > { %p3024_p0 = pnand %p3023_p13, %p3017_p8 }
0x1463   : > { %3027 = shalt.err (!%p3024_p0)
}
0x1464   : > { %s3071_s26 = smov 128   ;;  %s3072_s29 = smov 8  }
0x1465   : > { %2860 = dma.vmem_to_hbm [thread:$0]  (%p3176_p5), %s3877_s17, 256, %s3875_s0, %s3881_s25, %s3071_s26, %s3071_s26, %s3072_s29  }
0x1466 PF: > { %p2866_p1 = scmp.ge.s32.totalorder %s3062_s24, 2  ;;  %s2303_s15 = sand.u32 1, %s3050_s21  }
0x1467   : > { %s2304_s18 = scalar_lea.sflag [#allocation3], %s2303_s15 }
0x1468   : > { %p2863_p2 = pnand %p2866_p1, %p3180_p6 }
0x146a   : > { %3045 = dma.done.wait (!%p2863_p2), %s2304_s18, 256  }
0x146b   : > { %3047 = vsyncadd (!%p2863_p2), %s2304_s18, 4294967040  ;;  %p23_p3 = scmp.ge.s32.totalorder %s3163_s27, 4   ;;  %s3950_s21 = smov %s3054_s22 }
0x146c   : > { %s3951_s22 = smov %s3058_s23  ;;  %s3952_s23 = smov %s3174_s30 }
0x146d   : > { %s3953_s24 = smov %s3163_s27  ;;  %25 = sbr.rel (!%p23_p3) target bundleno = 5 (0x5), region = 117 }
0x1474   :  { %2317 = vsyncpa [#allocation3], 1 }
0x1475   :  { %2319 = vsyncpa [#allocation3 + $0x1], 1 }

</bundles_post_ra>
